<compile_context>
chip_gen: v7x
topology: tpu7x:2x2x1
jax: 0.10.0
libtpu: 0.0.40
codegen_flags: <defaults>
</compile_context>

<pallas_src>
import functools
import math

import jax
import jax.numpy as jnp
from jax.experimental import pallas as pl
from jax.experimental.pallas import tpu as pltpu


# ----------------------------------------------------------------------------
# In-kernel helpers
# ----------------------------------------------------------------------------
def _layer_norm(x, w, b, eps=1e-5):
    # F.layer_norm semantics: biased variance over last dim, eps inside rsqrt.
    mean = jnp.mean(x, axis=-1, keepdims=True)
    var = jnp.mean((x - mean) ** 2, axis=-1, keepdims=True)
    return (x - mean) * jax.lax.rsqrt(var + eps) * w + b


def _gelu_exact(x):
    # nn.GELU() default = exact erf formulation.
    return 0.5 * x * (1.0 + jax.lax.erf(x / jnp.sqrt(2.0).astype(x.dtype)))


# ----------------------------------------------------------------------------
# Fused transformer blocks kernel.
#   grid = (B // bb, n_layer); the output block is the resident accumulator
#   across the (arbitrary) layer axis.  x = x + attn(ln1(x)); x = x + mlp(ln2(x))
#   At the last layer, ln_f is applied before the block is written out.
# ----------------------------------------------------------------------------
def fused_blocks_kernel(n_head, t_valid,
                        x_ref,                            # (bb, T, C)   f32
                        ln1_w_ref, ln1_b_ref,             # (1, 1, C)    f32
                        w_attn_ref, b_attn_ref,           # (1, C, 3C) bf16 / (1, 1, 3C) f32
                        w_aproj_ref, b_aproj_ref,         # (1, C, C)  bf16 / (1, 1, C)  f32
                        ln2_w_ref, ln2_b_ref,             # (1, 1, C)    f32
                        w_fc_ref, b_fc_ref,               # (1, C, 4C) bf16 / (1, 1, 4C) f32
                        w_mproj_ref, b_mproj_ref,         # (1, 4C, C) bf16 / (1, 1, C)  f32
                        lnf_w_ref, lnf_b_ref,             # (1, C)       f32
                        o_ref):                           # (bb, T, C)   f32 (resident acc)
    layer = pl.program_id(1)
    last = pl.num_programs(1) - 1

    @pl.when(layer == 0)
    def _():
        o_ref[...] = x_ref[...]

    xb = o_ref[...]                                       # (bb, T, C) f32
    bb, T, C = xb.shape
    H = n_head
    hd = C // H
    x2 = xb.reshape(bb * T, C)                            # fold batch block into M

    # ---- Self attention (bidirectional, no causal mask, dropout disabled) ----
    h = _layer_norm(x2, ln1_w_ref[0, 0], ln1_b_ref[0, 0])
    qkv = jnp.dot(h.astype(jnp.bfloat16), w_attn_ref[0],
                  preferred_element_type=jnp.float32) + b_attn_ref[0, 0]

    scale = 1.0 / math.sqrt(hd)
    # fold softmax scale into q (f32) then keep q/k/v in bf16 only
    q = (qkv[:, 0 * C:1 * C] * scale).astype(jnp.bfloat16).reshape(bb, T, C)
    k = qkv[:, 1 * C:2 * C].astype(jnp.bfloat16).reshape(bb, T, C)
    v = qkv[:, 2 * C:3 * C].astype(jnp.bfloat16).reshape(bb, T, C)

    if T > t_valid:   # static: sequence was padded to a multiple of 8 -> mask pad keys
        key_mask = jax.lax.broadcasted_iota(jnp.int32, (1, 1, T), 2) < t_valid
    else:
        key_mask = None

    head_outs = []
    for i in range(H):                                    # static unroll over heads
        sl = slice(i * hd, (i + 1) * hd)
        qh = q[:, :, sl]
        kh = k[:, :, sl]
        vh = v[:, :, sl]
        s = jnp.einsum('btd,bsd->bts', qh, kh,
                       preferred_element_type=jnp.float32)      # (bb, T, T)
        if key_mask is not None:
            s = jnp.where(key_mask, s, jnp.float32(-1e30))
        s = s - jnp.max(s, axis=-1, keepdims=True)
        p = jnp.exp(s)
        denom = jnp.sum(p, axis=-1, keepdims=True)               # (bb, T, 1)
        yh = jnp.einsum('bts,bsd->btd', p.astype(jnp.bfloat16), vh,
                        preferred_element_type=jnp.float32)      # (bb, T, hd)
        # deferred softmax normalization on the small (T, hd) result
        yh = yh * pl.reciprocal(denom, approx=True)
        head_outs.append(yh)

    # single K=C output projection (instead of H matmuls with K=hd)
    y = jnp.concatenate(head_outs, axis=-1).reshape(bb * T, C)
    y = jnp.dot(y.astype(jnp.bfloat16), w_aproj_ref[0],
                preferred_element_type=jnp.float32) + b_aproj_ref[0, 0]
    x2 = x2 + y

    # ---- MLP ----
    h = _layer_norm(x2, ln2_w_ref[0, 0], ln2_b_ref[0, 0])
    h = jnp.dot(h.astype(jnp.bfloat16), w_fc_ref[0],
                preferred_element_type=jnp.float32) + b_fc_ref[0, 0]
    h = _gelu_exact(h)
    h = jnp.dot(h.astype(jnp.bfloat16), w_mproj_ref[0],
                preferred_element_type=jnp.float32) + b_mproj_ref[0, 0]
    x2 = x2 + h

    @pl.when(layer < last)
    def _():
        o_ref[...] = x2.reshape(bb, T, C)

    @pl.when(layer == last)
    def _():
        # fuse ln_f so the lm_head kernel does not recompute it per vocab tile
        o_ref[...] = _layer_norm(x2, lnf_w_ref[0], lnf_b_ref[0]).reshape(bb, T, C)


# ----------------------------------------------------------------------------
# Tied lm_head kernel.  Activations are already ln_f-normalized; a batch block
# is folded into the matmul M dimension and position 0 is dropped at write time.
#   logits[:, 1:] = x_norm[:, 1:t_valid] @ wte.T    (wte kept as (Vpad, C), contract on C)
# ----------------------------------------------------------------------------
def head_kernel(t_valid, x_ref, w_ref, o_ref):
    x = x_ref[...]                                        # (bbh, Tp, C) f32 (normalized)
    bbh, Tp, C = x.shape
    h = x.reshape(bbh * Tp, C).astype(jnp.bfloat16)
    w = w_ref[...]                                        # (tile_V, C) bf16
    res = jax.lax.dot_general(
        h, w, dimension_numbers=(((1,), (1,)), ((), ())),
        preferred_element_type=jnp.float32)               # (bbh*Tp, tile_V)
    res = res.reshape(bbh, Tp, -1)
    o_ref[...] = res[:, 1:t_valid, :]                     # drop position 0 per sequence


# ----------------------------------------------------------------------------
# VMEM-aware sizing helpers
# ----------------------------------------------------------------------------
def _vmem_capacity_bytes():
    try:
        cap = int(pltpu.get_tpu_info().vmem_capacity_bytes)
        if cap > 0:
            return cap
    except Exception:
        pass
    return 64 * 1024 * 1024          # conservative default (v7x-sized)


def _vmem_limit_bytes(vmem_cap):
    # leave headroom below physical (56 MiB on v7x, ~112 MiB on v5e/v6e)
    return min(int(vmem_cap * 0.875), 112 * 1024 * 1024)


def _choose_batch_block(B, T, C, vmem_cap):
    # per-layer matmul weights (bf16), double-buffered: 12*C^2 elems per layer
    weight_bytes = 2 * 12 * C * C * 2
    budget = int(vmem_cap * 0.85) - weight_bytes
    # rough per-token activation bytes inside the kernel:
    #   resident out block f32 (4C) + qkv bf16 (6C) + mlp hidden f32 (16C)
    #   + misc f32 temporaries (~8C) + score/prob rows (~2T f32)
    per_row = 4 * C + 6 * C + 16 * C + 8 * C + 2 * T * 4
    max_rows = max(T, budget // max(per_row, 1))
    target_rows = min(1024, max_rows)                     # bb*T ~512-1024 saturates MXU M
    bb = max(1, min(B, target_rows // max(T, 1)))
    if B >= 2:
        bb = max(1, min(bb, B // 2))                      # keep >= 2 parallel steps (v7x megacore)
    while B % bb != 0:
        bb -= 1
    return bb
    # TODO(synk): for B == 1 on v7x, split the query/time axis across the two
    # TensorCores instead of leaving one idle.


def _head_tiling(V, vmem_cap):
    cap = 4096 if vmem_cap >= 96 * 1024 * 1024 else 2048  # bigger vocab tile on v5e/v6e
    v128 = ((V + 127) // 128) * 128
    tile_V = min(cap, v128)
    v_pad = ((V + tile_V - 1) // tile_V) * tile_V
    return tile_V, v_pad


def _choose_head_batch_block(B, T, C, tile_V, vmem_cap):
    bbh = max(1, min(B, 512 // max(T, 1)))
    weight = 2 * tile_V * C * 2                           # double-buffered bf16 weight tile
    per_seq = T * C * 4 + 2 * T * tile_V * 4              # activations + (double-buffered) out
    while bbh > 1 and weight + bbh * per_seq > int(vmem_cap * 0.8):
        bbh -= 1
    while B % bbh != 0:
        bbh -= 1
    return bbh


# ----------------------------------------------------------------------------
# pallas_call wrappers
# ----------------------------------------------------------------------------
def run_blocks(x, stacked, lnf_w, lnf_b, n_head, t_valid, batch_block, vmem_limit):
    B, T, C = x.shape
    L = stacked["ln1_w"].shape[0]
    bb = batch_block
    grid = (B // bb, L)

    act_map = lambda bi, l: (bi, 0, 0)     # constant along layer axis -> resident
    w_map = lambda bi, l: (l, 0, 0)        # one layer's weights per (arbitrary) step
    c_map = lambda bi, l: (0, 0)           # ln_f params, constant

    names = ["ln1_w", "ln1_b", "w_attn", "b_attn", "w_aproj", "b_aproj",
             "ln2_w", "ln2_b", "w_fc", "b_fc", "w_mproj", "b_mproj"]
    weight_args = [stacked[n] for n in names]
    in_specs = ([pl.BlockSpec((bb, T, C), act_map)]
                + [pl.BlockSpec((1,) + w.shape[1:], w_map) for w in weight_args]
                + [pl.BlockSpec((1, C), c_map), pl.BlockSpec((1, C), c_map)])

    return pl.pallas_call(
        functools.partial(fused_blocks_kernel, n_head, t_valid),
        out_shape=jax.ShapeDtypeStruct((B, T, C), jnp.float32),
        grid=grid,
        in_specs=in_specs,
        out_specs=pl.BlockSpec((bb, T, C), act_map),
        compiler_params=pltpu.CompilerParams(
            dimension_semantics=("parallel", "arbitrary"),
            vmem_limit_bytes=vmem_limit),
    )(x, *weight_args, lnf_w, lnf_b)


def run_head(x_norm, wte_padded_bf16, tile_V, t_valid, bbh, vmem_limit):
    B, Tp, C = x_norm.shape
    Vpad = wte_padded_bf16.shape[0]
    grid = (Vpad // tile_V, B // bbh)      # vocab tiles outer: each weight tile DMA'd once

    return pl.pallas_call(
        functools.partial(head_kernel, t_valid),
        out_shape=jax.ShapeDtypeStruct((B, t_valid - 1, Vpad), jnp.float32),
        grid=grid,
        in_specs=[
            pl.BlockSpec((bbh, Tp, C), lambda vj, bi: (bi, 0, 0)),
            pl.BlockSpec((tile_V, C), lambda vj, bi: (vj, 0)),
        ],
        out_specs=pl.BlockSpec((bbh, t_valid - 1, tile_V), lambda vj, bi: (bi, 0, vj)),
        compiler_params=pltpu.CompilerParams(
            dimension_semantics=("parallel", "parallel"),
            vmem_limit_bytes=vmem_limit),
    )(x_norm, wte_padded_bf16)


# ----------------------------------------------------------------------------
# Parameter init (mimics _init_weights: normal(0, 0.02), zero biases, ones LN
# weight, c_proj std = 0.02 / sqrt(2 * n_layer)).  Per-layer weights are stacked
# along a leading n_layer axis; matmul weights stored in bf16, LN/bias in f32.
# ----------------------------------------------------------------------------
def init_params(key, *, vocab_size, block_size, n_embd, n_layer):
    C = n_embd
    L = n_layer
    proj_std = 0.02 / math.sqrt(2 * n_layer)
    keys = jax.random.split(key, 6)

    wte = 0.02 * jax.random.normal(keys[0], (vocab_size, C), jnp.float32)
    wpe = 0.02 * jax.random.normal(keys[1], (block_size, C), jnp.float32)

    blocks = dict(
        ln1_w=jnp.ones((L, 1, C), jnp.float32),
        ln1_b=jnp.zeros((L, 1, C), jnp.float32),
        w_attn=(0.02 * jax.random.normal(keys[2], (L, C, 3 * C), jnp.float32)
                ).astype(jnp.bfloat16),
        b_attn=jnp.zeros((L, 1, 3 * C), jnp.float32),
        w_aproj=(proj_std * jax.random.normal(keys[3], (L, C, C), jnp.float32)
                 ).astype(jnp.bfloat16),
        b_aproj=jnp.zeros((L, 1, C), jnp.float32),
        ln2_w=jnp.ones((L, 1, C), jnp.float32),
        ln2_b=jnp.zeros((L, 1, C), jnp.float32),
        w_fc=(0.02 * jax.random.normal(keys[4], (L, C, 4 * C), jnp.float32)
              ).astype(jnp.bfloat16),
        b_fc=jnp.zeros((L, 1, 4 * C), jnp.float32),
        w_mproj=(proj_std * jax.random.normal(keys[5], (L, 4 * C, C), jnp.float32)
                 ).astype(jnp.bfloat16),
        b_mproj=jnp.zeros((L, 1, C), jnp.float32),
    )
    lnf_w = jnp.ones((1, C), jnp.float32)
    lnf_b = jnp.zeros((1, C), jnp.float32)
    return dict(wte=wte, wpe=wpe, blocks=blocks, lnf_w=lnf_w, lnf_b=lnf_b)


# ----------------------------------------------------------------------------
# Full forward (dropout = 0 / eval mode -> identity)
# ----------------------------------------------------------------------------
def bidirectional_transformer_forward(params, idx, cond, *, n_head, block_size):
    b, t = idx.shape
    assert t <= block_size
    tok_emb = jnp.take(params["wte"], idx, axis=0)         # (b, t, C)  plain-JAX glue
    pos_emb = params["wpe"][:t]                            # (t, C)
    x = tok_emb + pos_emb[None, :, :]
    x = jnp.concatenate([cond.astype(jnp.float32), x], axis=1)   # (b, t_cond + t, C)

    B, T, C = x.shape
    t_valid = T
    Tp = ((T + 7) // 8) * 8                                # pad seq to multiple of 8
    if Tp != T:
        x = jnp.pad(x, ((0, 0), (0, Tp - T), (0, 0)))      # pad keys masked in-kernel

    vmem_cap = _vmem_capacity_bytes()
    vmem_limit = _vmem_limit_bytes(vmem_cap)

    bb = _choose_batch_block(B, Tp, C, vmem_cap)
    x_norm = run_blocks(x, params["blocks"], params["lnf_w"], params["lnf_b"],
                        n_head, t_valid, bb, vmem_limit)   # (B, Tp, C), ln_f already applied

    # tied lm_head: wte as (Vpad, C) bf16, contract on C inside the kernel
    V = params["wte"].shape[0]
    tile_V, Vpad = _head_tiling(V, vmem_cap)
    wte_bf16 = params["wte"].astype(jnp.bfloat16)
    if Vpad != V:
        wte_bf16 = jnp.pad(wte_bf16, ((0, Vpad - V), (0, 0)))

    bbh = _choose_head_batch_block(B, Tp, C, tile_V, vmem_cap)
    logits = run_head(x_norm, wte_bf16, tile_V, t_valid, bbh, vmem_limit)
    if Vpad != V:
        logits = logits[:, :, :V]
    return logits                                          # (B, T-1, V)


if __name__ == "__main__":
    # Small config consistent with the module's forward.
    vocab_size = 128
    block_size = 16
    n_embd = 64
    n_head = 4
    n_layer = 2

    B = 2
    t = 8          # token sequence length (<= block_size)
    t_cond = 8     # conditioning sequence length

    root = jax.random.PRNGKey(0)
    k_param, k_idx, k_cond = jax.random.split(root, 3)

    params = init_params(k_param, vocab_size=vocab_size, block_size=block_size,
                         n_embd=n_embd, n_layer=n_layer)

    idx = jax.random.randint(k_idx, (B, t), 0, vocab_size, dtype=jnp.int32)
    cond = 0.02 * jax.random.normal(k_cond, (B, t_cond, n_embd), jnp.float32)

    logits = bidirectional_transformer_forward(
        params, idx, cond, n_head=n_head, block_size=block_size)
    logits = jax.block_until_ready(logits)

    expected_T = t_cond + t
    assert logits.shape == (B, expected_T - 1, vocab_size), logits.shape
    assert bool(jnp.all(jnp.isfinite(logits)))
    print("KERNEL_OK")
</pallas_src>

<mosaic_0001>
module attributes {stable_mosaic.version = 11 : i64} {
  func.func @fused_blocks_kernel(%arg0: i32, %arg1: i32, %arg2: memref<1x16x64xf32, #tpu.memory_space<vmem>>, %arg3: memref<1x1x64xf32, #tpu.memory_space<vmem>>, %arg4: memref<1x1x64xf32, #tpu.memory_space<vmem>>, %arg5: memref<1x64x192xbf16, #tpu.memory_space<vmem>>, %arg6: memref<1x1x192xf32, #tpu.memory_space<vmem>>, %arg7: memref<1x64x64xbf16, #tpu.memory_space<vmem>>, %arg8: memref<1x1x64xf32, #tpu.memory_space<vmem>>, %arg9: memref<1x1x64xf32, #tpu.memory_space<vmem>>, %arg10: memref<1x1x64xf32, #tpu.memory_space<vmem>>, %arg11: memref<1x64x256xbf16, #tpu.memory_space<vmem>>, %arg12: memref<1x1x256xf32, #tpu.memory_space<vmem>>, %arg13: memref<1x256x64xbf16, #tpu.memory_space<vmem>>, %arg14: memref<1x1x64xf32, #tpu.memory_space<vmem>>, %arg15: memref<1x64xf32, #tpu.memory_space<vmem>>, %arg16: memref<1x64xf32, #tpu.memory_space<vmem>>, %arg17: memref<1x16x64xf32, #tpu.memory_space<vmem>>) attributes {dimension_semantics = [#tpu.dimension_semantics<parallel>, #tpu.dimension_semantics<arbitrary>], iteration_bounds = array<i64: 2, 2>, scalar_prefetch = 0 : i64, scratch_operands = 0 : i64, tpu.core_type = #tpu.core_type<tc>, window_params = [{transform_indices = @transform_0, window_bounds = array<i64: 1, 16, 64>}, {transform_indices = @transform_1, window_bounds = array<i64: 1, 1, 64>}, {transform_indices = @transform_2, window_bounds = array<i64: 1, 1, 64>}, {transform_indices = @transform_3, window_bounds = array<i64: 1, 64, 192>}, {transform_indices = @transform_4, window_bounds = array<i64: 1, 1, 192>}, {transform_indices = @transform_5, window_bounds = array<i64: 1, 64, 64>}, {transform_indices = @transform_6, window_bounds = array<i64: 1, 1, 64>}, {transform_indices = @transform_7, window_bounds = array<i64: 1, 1, 64>}, {transform_indices = @transform_8, window_bounds = array<i64: 1, 1, 64>}, {transform_indices = @transform_9, window_bounds = array<i64: 1, 64, 256>}, {transform_indices = @transform_10, window_bounds = array<i64: 1, 1, 256>}, {transform_indices = @transform_11, window_bounds = array<i64: 1, 256, 64>}, {transform_indices = @transform_12, window_bounds = array<i64: 1, 1, 64>}, {pipeline_mode = #tpu.pipeline_mode<synchronous>, transform_indices = @transform_13, window_bounds = array<i64: 1, 64>}, {pipeline_mode = #tpu.pipeline_mode<synchronous>, transform_indices = @transform_14, window_bounds = array<i64: 1, 64>}, {transform_indices = @transform_15, window_bounds = array<i64: 1, 16, 64>}]} {
    %c0_i32 = arith.constant 0 : i32
    %0 = arith.cmpi eq, %arg1, %c0_i32 : i32
    %1 = arith.extui %0 : i1 to i32
    %c0_i32_0 = arith.constant 0 : i32
    %2 = arith.cmpi ne, %1, %c0_i32_0 : i32
    scf.if %2 {
      %c0_75 = arith.constant 0 : index
      %c0_76 = arith.constant 0 : index
      %c0_77 = arith.constant 0 : index
      %191 = vector.load %arg2[%c0_75, %c0_76, %c0_77] : memref<1x16x64xf32, #tpu.memory_space<vmem>>, vector<1x16x64xf32>
      %c0_78 = arith.constant 0 : index
      %c0_79 = arith.constant 0 : index
      %c0_80 = arith.constant 0 : index
      %192 = vector.load %arg17[%c0_78, %c0_79, %c0_80] : memref<1x16x64xf32, #tpu.memory_space<vmem>>, vector<1x16x64xf32>
      tpu.vector_store %arg17[%c0_78, %c0_79, %c0_80], %191 {strides = array<i32>} : memref<1x16x64xf32, #tpu.memory_space<vmem>>, vector<1x16x64xf32>,
    } else {
    }
    %c0 = arith.constant 0 : index
    %c0_1 = arith.constant 0 : index
    %c0_2 = arith.constant 0 : index
    %3 = vector.load %arg17[%c0, %c0_1, %c0_2] : memref<1x16x64xf32, #tpu.memory_space<vmem>>, vector<1x16x64xf32>
    %4 = vector.shape_cast %3 : vector<1x16x64xf32> to vector<16x64xf32>
    %c0_3 = arith.constant 0 : index
    %c0_4 = arith.constant 0 : index
    %c0_5 = arith.constant 0 : index
    %5 = vector.load %arg3[%c0_3, %c0_4, %c0_5] : memref<1x1x64xf32, #tpu.memory_space<vmem>>, vector<1x1x64xf32>
    %6 = vector.shape_cast %5 : vector<1x1x64xf32> to vector<64xf32>
    %c0_6 = arith.constant 0 : index
    %c0_7 = arith.constant 0 : index
    %c0_8 = arith.constant 0 : index
    %7 = vector.load %arg4[%c0_6, %c0_7, %c0_8] : memref<1x1x64xf32, #tpu.memory_space<vmem>>, vector<1x1x64xf32>
    %8 = vector.shape_cast %7 : vector<1x1x64xf32> to vector<64xf32>
    %cst = arith.constant dense<0.000000e+00> : vector<16xf32>
    %9 = vector.multi_reduction <add>, %4, %cst [1] : vector<16x64xf32> to vector<16xf32>
    %10 = vector.shape_cast %9 : vector<16xf32> to vector<16x1xf32>
    %cst_9 = arith.constant 6.400000e+01 : f32
    %11 = vector.broadcast %cst_9 : f32 to vector<16x1xf32>
    %12 = arith.divf %10, %11 : vector<16x1xf32>
    %13 = vector.broadcast %12 : vector<16x1xf32> to vector<16x64xf32>
    %14 = arith.subf %4, %13 : vector<16x64xf32>
    %15 = arith.mulf %14, %14 : vector<16x64xf32>
    %cst_10 = arith.constant dense<0.000000e+00> : vector<16xf32>
    %16 = vector.multi_reduction <add>, %15, %cst_10 [1] : vector<16x64xf32> to vector<16xf32>
    %17 = vector.shape_cast %16 : vector<16xf32> to vector<16x1xf32>
    %cst_11 = arith.constant 6.400000e+01 : f32
    %18 = vector.broadcast %cst_11 : f32 to vector<16x1xf32>
    %19 = arith.divf %17, %18 : vector<16x1xf32>
    %20 = vector.broadcast %12 : vector<16x1xf32> to vector<16x64xf32>
    %21 = arith.subf %4, %20 : vector<16x64xf32>
    %cst_12 = arith.constant 9.99999974E-6 : f32
    %22 = vector.broadcast %cst_12 : f32 to vector<16x1xf32>
    %23 = arith.addf %19, %22 : vector<16x1xf32>
    %24 = math.rsqrt %23 : vector<16x1xf32>
    %25 = vector.broadcast %24 : vector<16x1xf32> to vector<16x64xf32>
    %26 = arith.mulf %21, %25 : vector<16x64xf32>
    %27 = vector.shape_cast %6 : vector<64xf32> to vector<1x64xf32>
    %28 = vector.broadcast %27 : vector<1x64xf32> to vector<16x64xf32>
    %29 = arith.mulf %26, %28 : vector<16x64xf32>
    %30 = vector.shape_cast %8 : vector<64xf32> to vector<1x64xf32>
    %31 = vector.broadcast %30 : vector<1x64xf32> to vector<16x64xf32>
    %32 = arith.addf %29, %31 : vector<16x64xf32>
    %33 = arith.truncf %32 : vector<16x64xf32> to vector<16x64xbf16>
    %c0_13 = arith.constant 0 : index
    %c0_14 = arith.constant 0 : index
    %c0_15 = arith.constant 0 : index
    %34 = vector.load %arg5[%c0_13, %c0_14, %c0_15] : memref<1x64x192xbf16, #tpu.memory_space<vmem>>, vector<1x64x192xbf16>
    %35 = vector.shape_cast %34 : vector<1x64x192xbf16> to vector<64x192xbf16>
    %cst_16 = arith.constant dense<0.000000e+00> : vector<16x192xf32>
    %36 = tpu.matmul %33, %35, %cst_16 {dimension_numbers = #tpu.dot_dimension_numbers<[1], [0], [0], [1], [0, 0, 1, 1], [], []>} : vector<16x64xbf16>, vector<64x192xbf16>, vector<16x192xf32> -> vector<16x192xf32>
    %c0_17 = arith.constant 0 : index
    %c0_18 = arith.constant 0 : index
    %c0_19 = arith.constant 0 : index
    %37 = vector.load %arg6[%c0_17, %c0_18, %c0_19] : memref<1x1x192xf32, #tpu.memory_space<vmem>>, vector<1x1x192xf32>
    %38 = vector.shape_cast %37 : vector<1x1x192xf32> to vector<192xf32>
    %39 = vector.shape_cast %38 : vector<192xf32> to vector<1x192xf32>
    %40 = vector.broadcast %39 : vector<1x192xf32> to vector<16x192xf32>
    %41 = arith.addf %36, %40 : vector<16x192xf32>
    %42 = vector.extract_strided_slice %41 {offsets = [0, 0], sizes = [16, 64], strides = [1, 1]} : vector<16x192xf32> to vector<16x64xf32>
    %cst_20 = arith.constant 2.500000e-01 : f32
    %43 = vector.broadcast %cst_20 : f32 to vector<16x64xf32>
    %44 = arith.mulf %42, %43 : vector<16x64xf32>
    %45 = arith.truncf %44 : vector<16x64xf32> to vector<16x64xbf16>
    %46 = vector.shape_cast %45 : vector<16x64xbf16> to vector<1x16x64xbf16>
    %47 = vector.extract_strided_slice %41 {offsets = [0, 64], sizes = [16, 64], strides = [1, 1]} : vector<16x192xf32> to vector<16x64xf32>
    %48 = arith.truncf %47 : vector<16x64xf32> to vector<16x64xbf16>
    %49 = vector.shape_cast %48 : vector<16x64xbf16> to vector<1x16x64xbf16>
    %50 = vector.extract_strided_slice %41 {offsets = [0, 128], sizes = [16, 64], strides = [1, 1]} : vector<16x192xf32> to vector<16x64xf32>
    %51 = arith.truncf %50 : vector<16x64xf32> to vector<16x64xbf16>
    %52 = vector.shape_cast %51 : vector<16x64xbf16> to vector<1x16x64xbf16>
    %53 = vector.extract_strided_slice %46 {offsets = [0, 0, 0], sizes = [1, 16, 16], strides = [1, 1, 1]} : vector<1x16x64xbf16> to vector<1x16x16xbf16>
    %54 = vector.extract_strided_slice %49 {offsets = [0, 0, 0], sizes = [1, 16, 16], strides = [1, 1, 1]} : vector<1x16x64xbf16> to vector<1x16x16xbf16>
    %55 = vector.extract_strided_slice %52 {offsets = [0, 0, 0], sizes = [1, 16, 16], strides = [1, 1, 1]} : vector<1x16x64xbf16> to vector<1x16x16xbf16>
    "tpu.trace_start"() <{level = 10 : i32, message = "btd,bsd->bts"}> : () -> ()
    %cst_21 = arith.constant dense<0.000000e+00> : vector<1x16x16xf32>
    %56 = tpu.matmul %53, %54, %cst_21 {dimension_numbers = #tpu.dot_dimension_numbers<[2], [2], [1], [1], [0, 0, 0, 1, 1, 1], [0], [0]>} : vector<1x16x16xbf16>, vector<1x16x16xbf16>, vector<1x16x16xf32> -> vector<1x16x16xf32>
    "tpu.trace_stop"() : () -> ()
    %cst_22 = arith.constant dense<0xFF800000> : vector<1x16xf32>
    %57 = vector.multi_reduction <maximumf>, %56, %cst_22 [2] : vector<1x16x16xf32> to vector<1x16xf32>
    %58 = vector.shape_cast %57 : vector<1x16xf32> to vector<1x16x1xf32>
    %59 = vector.broadcast %58 : vector<1x16x1xf32> to vector<1x16x16xf32>
    %60 = arith.subf %56, %59 : vector<1x16x16xf32>
    %61 = math.exp %60 : vector<1x16x16xf32>
    %cst_23 = arith.constant dense<0.000000e+00> : vector<1x16xf32>
    %62 = vector.multi_reduction <add>, %61, %cst_23 [2] : vector<1x16x16xf32> to vector<1x16xf32>
    %63 = vector.shape_cast %62 : vector<1x16xf32> to vector<1x16x1xf32>
    %64 = arith.truncf %61 : vector<1x16x16xf32> to vector<1x16x16xbf16>
    "tpu.trace_start"() <{level = 10 : i32, message = "bts,bsd->btd"}> : () -> ()
    %cst_24 = arith.constant dense<0.000000e+00> : vector<1x16x16xf32>
    %65 = tpu.matmul %64, %55, %cst_24 {dimension_numbers = #tpu.dot_dimension_numbers<[2], [1], [1], [2], [0, 0, 0, 1, 1, 2], [0], [0]>} : vector<1x16x16xbf16>, vector<1x16x16xbf16>, vector<1x16x16xf32> -> vector<1x16x16xf32>
    "tpu.trace_stop"() : () -> ()
    %66 = tpu.reciprocal %63 {approx = true} : vector<1x16x1xf32> -> vector<1x16x1xf32>
    %67 = vector.broadcast %66 : vector<1x16x1xf32> to vector<1x16x16xf32>
    %68 = arith.mulf %65, %67 : vector<1x16x16xf32>
    %69 = vector.extract_strided_slice %46 {offsets = [0, 0, 16], sizes = [1, 16, 16], strides = [1, 1, 1]} : vector<1x16x64xbf16> to vector<1x16x16xbf16>
    %70 = vector.extract_strided_slice %49 {offsets = [0, 0, 16], sizes = [1, 16, 16], strides = [1, 1, 1]} : vector<1x16x64xbf16> to vector<1x16x16xbf16>
    %71 = vector.extract_strided_slice %52 {offsets = [0, 0, 16], sizes = [1, 16, 16], strides = [1, 1, 1]} : vector<1x16x64xbf16> to vector<1x16x16xbf16>
    "tpu.trace_start"() <{level = 10 : i32, message = "btd,bsd->bts"}> : () -> ()
    %cst_25 = arith.constant dense<0.000000e+00> : vector<1x16x16xf32>
    %72 = tpu.matmul %69, %70, %cst_25 {dimension_numbers = #tpu.dot_dimension_numbers<[2], [2], [1], [1], [0, 0, 0, 1, 1, 1], [0], [0]>} : vector<1x16x16xbf16>, vector<1x16x16xbf16>, vector<1x16x16xf32> -> vector<1x16x16xf32>
    "tpu.trace_stop"() : () -> ()
    %cst_26 = arith.constant dense<0xFF800000> : vector<1x16xf32>
    %73 = vector.multi_reduction <maximumf>, %72, %cst_26 [2] : vector<1x16x16xf32> to vector<1x16xf32>
    %74 = vector.shape_cast %73 : vector<1x16xf32> to vector<1x16x1xf32>
    %75 = vector.broadcast %74 : vector<1x16x1xf32> to vector<1x16x16xf32>
    %76 = arith.subf %72, %75 : vector<1x16x16xf32>
    %77 = math.exp %76 : vector<1x16x16xf32>
    %cst_27 = arith.constant dense<0.000000e+00> : vector<1x16xf32>
    %78 = vector.multi_reduction <add>, %77, %cst_27 [2] : vector<1x16x16xf32> to vector<1x16xf32>
    %79 = vector.shape_cast %78 : vector<1x16xf32> to vector<1x16x1xf32>
    %80 = arith.truncf %77 : vector<1x16x16xf32> to vector<1x16x16xbf16>
    "tpu.trace_start"() <{level = 10 : i32, message = "bts,bsd->btd"}> : () -> ()
    %cst_28 = arith.constant dense<0.000000e+00> : vector<1x16x16xf32>
    %81 = tpu.matmul %80, %71, %cst_28 {dimension_numbers = #tpu.dot_dimension_numbers<[2], [1], [1], [2], [0, 0, 0, 1, 1, 2], [0], [0]>} : vector<1x16x16xbf16>, vector<1x16x16xbf16>, vector<1x16x16xf32> -> vector<1x16x16xf32>
    "tpu.trace_stop"() : () -> ()
    %82 = tpu.reciprocal %79 {approx = true} : vector<1x16x1xf32> -> vector<1x16x1xf32>
    %83 = vector.broadcast %82 : vector<1x16x1xf32> to vector<1x16x16xf32>
    %84 = arith.mulf %81, %83 : vector<1x16x16xf32>
    %85 = vector.extract_strided_slice %46 {offsets = [0, 0, 32], sizes = [1, 16, 16], strides = [1, 1, 1]} : vector<1x16x64xbf16> to vector<1x16x16xbf16>
    %86 = vector.extract_strided_slice %49 {offsets = [0, 0, 32], sizes = [1, 16, 16], strides = [1, 1, 1]} : vector<1x16x64xbf16> to vector<1x16x16xbf16>
    %87 = vector.extract_strided_slice %52 {offsets = [0, 0, 32], sizes = [1, 16, 16], strides = [1, 1, 1]} : vector<1x16x64xbf16> to vector<1x16x16xbf16>
    "tpu.trace_start"() <{level = 10 : i32, message = "btd,bsd->bts"}> : () -> ()
    %cst_29 = arith.constant dense<0.000000e+00> : vector<1x16x16xf32>
    %88 = tpu.matmul %85, %86, %cst_29 {dimension_numbers = #tpu.dot_dimension_numbers<[2], [2], [1], [1], [0, 0, 0, 1, 1, 1], [0], [0]>} : vector<1x16x16xbf16>, vector<1x16x16xbf16>, vector<1x16x16xf32> -> vector<1x16x16xf32>
    "tpu.trace_stop"() : () -> ()
    %cst_30 = arith.constant dense<0xFF800000> : vector<1x16xf32>
    %89 = vector.multi_reduction <maximumf>, %88, %cst_30 [2] : vector<1x16x16xf32> to vector<1x16xf32>
    %90 = vector.shape_cast %89 : vector<1x16xf32> to vector<1x16x1xf32>
    %91 = vector.broadcast %90 : vector<1x16x1xf32> to vector<1x16x16xf32>
    %92 = arith.subf %88, %91 : vector<1x16x16xf32>
    %93 = math.exp %92 : vector<1x16x16xf32>
    %cst_31 = arith.constant dense<0.000000e+00> : vector<1x16xf32>
    %94 = vector.multi_reduction <add>, %93, %cst_31 [2] : vector<1x16x16xf32> to vector<1x16xf32>
    %95 = vector.shape_cast %94 : vector<1x16xf32> to vector<1x16x1xf32>
    %96 = arith.truncf %93 : vector<1x16x16xf32> to vector<1x16x16xbf16>
    "tpu.trace_start"() <{level = 10 : i32, message = "bts,bsd->btd"}> : () -> ()
    %cst_32 = arith.constant dense<0.000000e+00> : vector<1x16x16xf32>
    %97 = tpu.matmul %96, %87, %cst_32 {dimension_numbers = #tpu.dot_dimension_numbers<[2], [1], [1], [2], [0, 0, 0, 1, 1, 2], [0], [0]>} : vector<1x16x16xbf16>, vector<1x16x16xbf16>, vector<1x16x16xf32> -> vector<1x16x16xf32>
    "tpu.trace_stop"() : () -> ()
    %98 = tpu.reciprocal %95 {approx = true} : vector<1x16x1xf32> -> vector<1x16x1xf32>
    %99 = vector.broadcast %98 : vector<1x16x1xf32> to vector<1x16x16xf32>
    %100 = arith.mulf %97, %99 : vector<1x16x16xf32>
    %101 = vector.extract_strided_slice %46 {offsets = [0, 0, 48], sizes = [1, 16, 16], strides = [1, 1, 1]} : vector<1x16x64xbf16> to vector<1x16x16xbf16>
    %102 = vector.extract_strided_slice %49 {offsets = [0, 0, 48], sizes = [1, 16, 16], strides = [1, 1, 1]} : vector<1x16x64xbf16> to vector<1x16x16xbf16>
    %103 = vector.extract_strided_slice %52 {offsets = [0, 0, 48], sizes = [1, 16, 16], strides = [1, 1, 1]} : vector<1x16x64xbf16> to vector<1x16x16xbf16>
    "tpu.trace_start"() <{level = 10 : i32, message = "btd,bsd->bts"}> : () -> ()
    %cst_33 = arith.constant dense<0.000000e+00> : vector<1x16x16xf32>
    %104 = tpu.matmul %101, %102, %cst_33 {dimension_numbers = #tpu.dot_dimension_numbers<[2], [2], [1], [1], [0, 0, 0, 1, 1, 1], [0], [0]>} : vector<1x16x16xbf16>, vector<1x16x16xbf16>, vector<1x16x16xf32> -> vector<1x16x16xf32>
    "tpu.trace_stop"() : () -> ()
    %cst_34 = arith.constant dense<0xFF800000> : vector<1x16xf32>
    %105 = vector.multi_reduction <maximumf>, %104, %cst_34 [2] : vector<1x16x16xf32> to vector<1x16xf32>
    %106 = vector.shape_cast %105 : vector<1x16xf32> to vector<1x16x1xf32>
    %107 = vector.broadcast %106 : vector<1x16x1xf32> to vector<1x16x16xf32>
    %108 = arith.subf %104, %107 : vector<1x16x16xf32>
    %109 = math.exp %108 : vector<1x16x16xf32>
    %cst_35 = arith.constant dense<0.000000e+00> : vector<1x16xf32>
    %110 = vector.multi_reduction <add>, %109, %cst_35 [2] : vector<1x16x16xf32> to vector<1x16xf32>
    %111 = vector.shape_cast %110 : vector<1x16xf32> to vector<1x16x1xf32>
    %112 = arith.truncf %109 : vector<1x16x16xf32> to vector<1x16x16xbf16>
    "tpu.trace_start"() <{level = 10 : i32, message = "bts,bsd->btd"}> : () -> ()
    %cst_36 = arith.constant dense<0.000000e+00> : vector<1x16x16xf32>
    %113 = tpu.matmul %112, %103, %cst_36 {dimension_numbers = #tpu.dot_dimension_numbers<[2], [1], [1], [2], [0, 0, 0, 1, 1, 2], [0], [0]>} : vector<1x16x16xbf16>, vector<1x16x16xbf16>, vector<1x16x16xf32> -> vector<1x16x16xf32>
    "tpu.trace_stop"() : () -> ()
    %114 = tpu.reciprocal %111 {approx = true} : vector<1x16x1xf32> -> vector<1x16x1xf32>
    %115 = vector.broadcast %114 : vector<1x16x1xf32> to vector<1x16x16xf32>
    %116 = arith.mulf %113, %115 : vector<1x16x16xf32>
    %117 = tpu.concatenate %68, %84, %100, %116 in 2 : vector<1x16x16xf32>, vector<1x16x16xf32>, vector<1x16x16xf32>, vector<1x16x16xf32> -> vector<1x16x64xf32>
    %118 = vector.shape_cast %117 : vector<1x16x64xf32> to vector<16x64xf32>
    %119 = arith.truncf %118 : vector<16x64xf32> to vector<16x64xbf16>
    %c0_37 = arith.constant 0 : index
    %c0_38 = arith.constant 0 : index
    %c0_39 = arith.constant 0 : index
    %120 = vector.load %arg7[%c0_37, %c0_38, %c0_39] : memref<1x64x64xbf16, #tpu.memory_space<vmem>>, vector<1x64x64xbf16>
    %121 = vector.shape_cast %120 : vector<1x64x64xbf16> to vector<64x64xbf16>
    %cst_40 = arith.constant dense<0.000000e+00> : vector<16x64xf32>
    %122 = tpu.matmul %119, %121, %cst_40 {dimension_numbers = #tpu.dot_dimension_numbers<[1], [0], [0], [1], [0, 0, 1, 1], [], []>} : vector<16x64xbf16>, vector<64x64xbf16>, vector<16x64xf32> -> vector<16x64xf32>
    %c0_41 = arith.constant 0 : index
    %c0_42 = arith.constant 0 : index
    %c0_43 = arith.constant 0 : index
    %123 = vector.load %arg8[%c0_41, %c0_42, %c0_43] : memref<1x1x64xf32, #tpu.memory_space<vmem>>, vector<1x1x64xf32>
    %124 = vector.shape_cast %123 : vector<1x1x64xf32> to vector<64xf32>
    %125 = vector.shape_cast %124 : vector<64xf32> to vector<1x64xf32>
    %126 = vector.broadcast %125 : vector<1x64xf32> to vector<16x64xf32>
    %127 = arith.addf %122, %126 : vector<16x64xf32>
    %128 = arith.addf %4, %127 : vector<16x64xf32>
    %c0_44 = arith.constant 0 : index
    %c0_45 = arith.constant 0 : index
    %c0_46 = arith.constant 0 : index
    %129 = vector.load %arg9[%c0_44, %c0_45, %c0_46] : memref<1x1x64xf32, #tpu.memory_space<vmem>>, vector<1x1x64xf32>
    %130 = vector.shape_cast %129 : vector<1x1x64xf32> to vector<64xf32>
    %c0_47 = arith.constant 0 : index
    %c0_48 = arith.constant 0 : index
    %c0_49 = arith.constant 0 : index
    %131 = vector.load %arg10[%c0_47, %c0_48, %c0_49] : memref<1x1x64xf32, #tpu.memory_space<vmem>>, vector<1x1x64xf32>
    %132 = vector.shape_cast %131 : vector<1x1x64xf32> to vector<64xf32>
    %cst_50 = arith.constant dense<0.000000e+00> : vector<16xf32>
    %133 = vector.multi_reduction <add>, %128, %cst_50 [1] : vector<16x64xf32> to vector<16xf32>
    %134 = vector.shape_cast %133 : vector<16xf32> to vector<16x1xf32>
    %cst_51 = arith.constant 6.400000e+01 : f32
    %135 = vector.broadcast %cst_51 : f32 to vector<16x1xf32>
    %136 = arith.divf %134, %135 : vector<16x1xf32>
    %137 = vector.broadcast %136 : vector<16x1xf32> to vector<16x64xf32>
    %138 = arith.subf %128, %137 : vector<16x64xf32>
    %139 = arith.mulf %138, %138 : vector<16x64xf32>
    %cst_52 = arith.constant dense<0.000000e+00> : vector<16xf32>
    %140 = vector.multi_reduction <add>, %139, %cst_52 [1] : vector<16x64xf32> to vector<16xf32>
    %141 = vector.shape_cast %140 : vector<16xf32> to vector<16x1xf32>
    %cst_53 = arith.constant 6.400000e+01 : f32
    %142 = vector.broadcast %cst_53 : f32 to vector<16x1xf32>
    %143 = arith.divf %141, %142 : vector<16x1xf32>
    %144 = vector.broadcast %136 : vector<16x1xf32> to vector<16x64xf32>
    %145 = arith.subf %128, %144 : vector<16x64xf32>
    %cst_54 = arith.constant 9.99999974E-6 : f32
    %146 = vector.broadcast %cst_54 : f32 to vector<16x1xf32>
    %147 = arith.addf %143, %146 : vector<16x1xf32>
    %148 = math.rsqrt %147 : vector<16x1xf32>
    %149 = vector.broadcast %148 : vector<16x1xf32> to vector<16x64xf32>
    %150 = arith.mulf %145, %149 : vector<16x64xf32>
    %151 = vector.shape_cast %130 : vector<64xf32> to vector<1x64xf32>
    %152 = vector.broadcast %151 : vector<1x64xf32> to vector<16x64xf32>
    %153 = arith.mulf %150, %152 : vector<16x64xf32>
    %154 = vector.shape_cast %132 : vector<64xf32> to vector<1x64xf32>
    %155 = vector.broadcast %154 : vector<1x64xf32> to vector<16x64xf32>
    %156 = arith.addf %153, %155 : vector<16x64xf32>
    %157 = arith.truncf %156 : vector<16x64xf32> to vector<16x64xbf16>
    %c0_55 = arith.constant 0 : index
    %c0_56 = arith.constant 0 : index
    %c0_57 = arith.constant 0 : index
    %158 = vector.load %arg11[%c0_55, %c0_56, %c0_57] : memref<1x64x256xbf16, #tpu.memory_space<vmem>>, vector<1x64x256xbf16>
    %159 = vector.shape_cast %158 : vector<1x64x256xbf16> to vector<64x256xbf16>
    %cst_58 = arith.constant dense<0.000000e+00> : vector<16x256xf32>
    %160 = tpu.matmul %157, %159, %cst_58 {dimension_numbers = #tpu.dot_dimension_numbers<[1], [0], [0], [1], [0, 0, 1, 1], [], []>} : vector<16x64xbf16>, vector<64x256xbf16>, vector<16x256xf32> -> vector<16x256xf32>
    %c0_59 = arith.constant 0 : index
    %c0_60 = arith.constant 0 : index
    %c0_61 = arith.constant 0 : index
    %161 = vector.load %arg12[%c0_59, %c0_60, %c0_61] : memref<1x1x256xf32, #tpu.memory_space<vmem>>, vector<1x1x256xf32>
    %162 = vector.shape_cast %161 : vector<1x1x256xf32> to vector<256xf32>
    %163 = vector.shape_cast %162 : vector<256xf32> to vector<1x256xf32>
    %164 = vector.broadcast %163 : vector<1x256xf32> to vector<16x256xf32>
    %165 = arith.addf %160, %164 : vector<16x256xf32>
    %cst_62 = arith.constant 5.000000e-01 : f32
    %166 = vector.broadcast %cst_62 : f32 to vector<16x256xf32>
    %167 = arith.mulf %166, %165 : vector<16x256xf32>
    %cst_63 = arith.constant 2.000000e+00 : f32
    %168 = math.sqrt %cst_63 : f32
    %169 = vector.broadcast %168 : f32 to vector<16x256xf32>
    %170 = arith.divf %165, %169 : vector<16x256xf32>
    %171 = math.erf %170 : vector<16x256xf32>
    %cst_64 = arith.constant 1.000000e+00 : f32
    %172 = vector.broadcast %cst_64 : f32 to vector<16x256xf32>
    %173 = arith.addf %172, %171 : vector<16x256xf32>
    %174 = arith.mulf %167, %173 : vector<16x256xf32>
    %175 = arith.truncf %174 : vector<16x256xf32> to vector<16x256xbf16>
    %c0_65 = arith.constant 0 : index
    %c0_66 = arith.constant 0 : index
    %c0_67 = arith.constant 0 : index
    %176 = vector.load %arg13[%c0_65, %c0_66, %c0_67] : memref<1x256x64xbf16, #tpu.memory_space<vmem>>, vector<1x256x64xbf16>
    %177 = vector.shape_cast %176 : vector<1x256x64xbf16> to vector<256x64xbf16>
    %cst_68 = arith.constant dense<0.000000e+00> : vector<16x64xf32>
    %178 = tpu.matmul %175, %177, %cst_68 {dimension_numbers = #tpu.dot_dimension_numbers<[1], [0], [0], [1], [0, 0, 1, 1], [], []>} : vector<16x256xbf16>, vector<256x64xbf16>, vector<16x64xf32> -> vector<16x64xf32>
    %c0_69 = arith.constant 0 : index
    %c0_70 = arith.constant 0 : index
    %c0_71 = arith.constant 0 : index
    %179 = vector.load %arg14[%c0_69, %c0_70, %c0_71] : memref<1x1x64xf32, #tpu.memory_space<vmem>>, vector<1x1x64xf32>
    %180 = vector.shape_cast %179 : vector<1x1x64xf32> to vector<64xf32>
    %181 = vector.shape_cast %180 : vector<64xf32> to vector<1x64xf32>
    %182 = vector.broadcast %181 : vector<1x64xf32> to vector<16x64xf32>
    %183 = arith.addf %178, %182 : vector<16x64xf32>
    %184 = arith.addf %128, %183 : vector<16x64xf32>
    %c1_i32 = arith.constant 1 : i32
    %185 = arith.cmpi slt, %arg1, %c1_i32 : i32
    %186 = arith.extui %185 : i1 to i32
    %c0_i32_72 = arith.constant 0 : i32
    %187 = arith.cmpi ne, %186, %c0_i32_72 : i32
    scf.if %187 {
      %191 = vector.shape_cast %184 : vector<16x64xf32> to vector<1x16x64xf32>
      %c0_75 = arith.constant 0 : index
      %c0_76 = arith.constant 0 : index
      %c0_77 = arith.constant 0 : index
      %192 = vector.load %arg17[%c0_75, %c0_76, %c0_77] : memref<1x16x64xf32, #tpu.memory_space<vmem>>, vector<1x16x64xf32>
      tpu.vector_store %arg17[%c0_75, %c0_76, %c0_77], %191 {strides = array<i32>} : memref<1x16x64xf32, #tpu.memory_space<vmem>>, vector<1x16x64xf32>,
    } else {
    }
    %c1_i32_73 = arith.constant 1 : i32
    %188 = arith.cmpi eq, %arg1, %c1_i32_73 : i32
    %189 = arith.extui %188 : i1 to i32
    %c0_i32_74 = arith.constant 0 : i32
    %190 = arith.cmpi ne, %189, %c0_i32_74 : i32
    scf.if %190 {
      %c0_75 = arith.constant 0 : index
      %c0_76 = arith.constant 0 : index
      %191 = vector.load %arg15[%c0_75, %c0_76] : memref<1x64xf32, #tpu.memory_space<vmem>>, vector<1x64xf32>
      %192 = vector.shape_cast %191 : vector<1x64xf32> to vector<64xf32>
      %c0_77 = arith.constant 0 : index
      %c0_78 = arith.constant 0 : index
      %193 = vector.load %arg16[%c0_77, %c0_78] : memref<1x64xf32, #tpu.memory_space<vmem>>, vector<1x64xf32>
      %194 = vector.shape_cast %193 : vector<1x64xf32> to vector<64xf32>
      %cst_79 = arith.constant dense<0.000000e+00> : vector<16xf32>
      %195 = vector.multi_reduction <add>, %184, %cst_79 [1] : vector<16x64xf32> to vector<16xf32>
      %196 = vector.shape_cast %195 : vector<16xf32> to vector<16x1xf32>
      %cst_80 = arith.constant 6.400000e+01 : f32
      %197 = vector.broadcast %cst_80 : f32 to vector<16x1xf32>
      %198 = arith.divf %196, %197 : vector<16x1xf32>
      %199 = vector.broadcast %198 : vector<16x1xf32> to vector<16x64xf32>
      %200 = arith.subf %184, %199 : vector<16x64xf32>
      %201 = arith.mulf %200, %200 : vector<16x64xf32>
      %cst_81 = arith.constant dense<0.000000e+00> : vector<16xf32>
      %202 = vector.multi_reduction <add>, %201, %cst_81 [1] : vector<16x64xf32> to vector<16xf32>
      %203 = vector.shape_cast %202 : vector<16xf32> to vector<16x1xf32>
      %cst_82 = arith.constant 6.400000e+01 : f32
      %204 = vector.broadcast %cst_82 : f32 to vector<16x1xf32>
      %205 = arith.divf %203, %204 : vector<16x1xf32>
      %206 = vector.broadcast %198 : vector<16x1xf32> to vector<16x64xf32>
      %207 = arith.subf %184, %206 : vector<16x64xf32>
      %cst_83 = arith.constant 9.99999974E-6 : f32
      %208 = vector.broadcast %cst_83 : f32 to vector<16x1xf32>
      %209 = arith.addf %205, %208 : vector<16x1xf32>
      %210 = math.rsqrt %209 : vector<16x1xf32>
      %211 = vector.broadcast %210 : vector<16x1xf32> to vector<16x64xf32>
      %212 = arith.mulf %207, %211 : vector<16x64xf32>
      %213 = vector.shape_cast %192 : vector<64xf32> to vector<1x64xf32>
      %214 = vector.broadcast %213 : vector<1x64xf32> to vector<16x64xf32>
      %215 = arith.mulf %212, %214 : vector<16x64xf32>
      %216 = vector.shape_cast %194 : vector<64xf32> to vector<1x64xf32>
      %217 = vector.broadcast %216 : vector<1x64xf32> to vector<16x64xf32>
      %218 = arith.addf %215, %217 : vector<16x64xf32>
      %219 = vector.shape_cast %218 : vector<16x64xf32> to vector<1x16x64xf32>
      %c0_84 = arith.constant 0 : index
      %c0_85 = arith.constant 0 : index
      %c0_86 = arith.constant 0 : index
      %220 = vector.load %arg17[%c0_84, %c0_85, %c0_86] : memref<1x16x64xf32, #tpu.memory_space<vmem>>, vector<1x16x64xf32>
      tpu.vector_store %arg17[%c0_84, %c0_85, %c0_86], %219 {strides = array<i32>} : memref<1x16x64xf32, #tpu.memory_space<vmem>>, vector<1x16x64xf32>,
    } else {
    }
    return
  }
  func.func @transform_0(%arg0: i32, %arg1: i32) -> (i32, i32, i32) {
    %c0_i32 = arith.constant 0 : i32
    %c0_i32_0 = arith.constant 0 : i32
    %c0_i32_1 = arith.constant 0 : i32
    return %arg0, %c0_i32, %c0_i32_0 : i32, i32, i32
  }
  func.func @transform_1(%arg0: i32, %arg1: i32) -> (i32, i32, i32) {
    %c0_i32 = arith.constant 0 : i32
    %c0_i32_0 = arith.constant 0 : i32
    %c0_i32_1 = arith.constant 0 : i32
    return %arg1, %c0_i32, %c0_i32_0 : i32, i32, i32
  }
  func.func @transform_2(%arg0: i32, %arg1: i32) -> (i32, i32, i32) {
    %c0_i32 = arith.constant 0 : i32
    %c0_i32_0 = arith.constant 0 : i32
    %c0_i32_1 = arith.constant 0 : i32
    return %arg1, %c0_i32, %c0_i32_0 : i32, i32, i32
  }
  func.func @transform_3(%arg0: i32, %arg1: i32) -> (i32, i32, i32) {
    %c0_i32 = arith.constant 0 : i32
    %c0_i32_0 = arith.constant 0 : i32
    %c0_i32_1 = arith.constant 0 : i32
    return %arg1, %c0_i32, %c0_i32_0 : i32, i32, i32
  }
  func.func @transform_4(%arg0: i32, %arg1: i32) -> (i32, i32, i32) {
    %c0_i32 = arith.constant 0 : i32
    %c0_i32_0 = arith.constant 0 : i32
    %c0_i32_1 = arith.constant 0 : i32
    return %arg1, %c0_i32, %c0_i32_0 : i32, i32, i32
  }
  func.func @transform_5(%arg0: i32, %arg1: i32) -> (i32, i32, i32) {
    %c0_i32 = arith.constant 0 : i32
    %c0_i32_0 = arith.constant 0 : i32
    %c0_i32_1 = arith.constant 0 : i32
    return %arg1, %c0_i32, %c0_i32_0 : i32, i32, i32
  }
  func.func @transform_6(%arg0: i32, %arg1: i32) -> (i32, i32, i32) {
    %c0_i32 = arith.constant 0 : i32
    %c0_i32_0 = arith.constant 0 : i32
    %c0_i32_1 = arith.constant 0 : i32
    return %arg1, %c0_i32, %c0_i32_0 : i32, i32, i32
  }
  func.func @transform_7(%arg0: i32, %arg1: i32) -> (i32, i32, i32) {
    %c0_i32 = arith.constant 0 : i32
    %c0_i32_0 = arith.constant 0 : i32
    %c0_i32_1 = arith.constant 0 : i32
    return %arg1, %c0_i32, %c0_i32_0 : i32, i32, i32
  }
  func.func @transform_8(%arg0: i32, %arg1: i32) -> (i32, i32, i32) {
    %c0_i32 = arith.constant 0 : i32
    %c0_i32_0 = arith.constant 0 : i32
    %c0_i32_1 = arith.constant 0 : i32
    return %arg1, %c0_i32, %c0_i32_0 : i32, i32, i32
  }
  func.func @transform_9(%arg0: i32, %arg1: i32) -> (i32, i32, i32) {
    %c0_i32 = arith.constant 0 : i32
    %c0_i32_0 = arith.constant 0 : i32
    %c0_i32_1 = arith.constant 0 : i32
    return %arg1, %c0_i32, %c0_i32_0 : i32, i32, i32
  }
  func.func @transform_10(%arg0: i32, %arg1: i32) -> (i32, i32, i32) {
    %c0_i32 = arith.constant 0 : i32
    %c0_i32_0 = arith.constant 0 : i32
    %c0_i32_1 = arith.constant 0 : i32
    return %arg1, %c0_i32, %c0_i32_0 : i32, i32, i32
  }
  func.func @transform_11(%arg0: i32, %arg1: i32) -> (i32, i32, i32) {
    %c0_i32 = arith.constant 0 : i32
    %c0_i32_0 = arith.constant 0 : i32
    %c0_i32_1 = arith.constant 0 : i32
    return %arg1, %c0_i32, %c0_i32_0 : i32, i32, i32
  }
  func.func @transform_12(%arg0: i32, %arg1: i32) -> (i32, i32, i32) {
    %c0_i32 = arith.constant 0 : i32
    %c0_i32_0 = arith.constant 0 : i32
    %c0_i32_1 = arith.constant 0 : i32
    return %arg1, %c0_i32, %c0_i32_0 : i32, i32, i32
  }
  func.func @transform_13(%arg0: i32, %arg1: i32) -> (i32, i32) {
    %c0_i32 = arith.constant 0 : i32
    %c0_i32_0 = arith.constant 0 : i32
    %c0_i32_1 = arith.constant 0 : i32
    return %c0_i32, %c0_i32_0 : i32, i32
  }
  func.func @transform_14(%arg0: i32, %arg1: i32) -> (i32, i32) {
    %c0_i32 = arith.constant 0 : i32
    %c0_i32_0 = arith.constant 0 : i32
    %c0_i32_1 = arith.constant 0 : i32
    return %c0_i32, %c0_i32_0 : i32, i32
  }
  func.func @transform_15(%arg0: i32, %arg1: i32) -> (i32, i32, i32) {
    %c0_i32 = arith.constant 0 : i32
    %c0_i32_0 = arith.constant 0 : i32
    %c0_i32_1 = arith.constant 0 : i32
    return %arg0, %c0_i32, %c0_i32_0 : i32, i32, i32
  }
}

</mosaic_0001>

<bundles_post_ra>
// kernel: tpu_custom_call.1
= control target key start
LH: loop header
LB: loop body
LE: loop exit
PB: predicated region body
PF: predicated region fallthrough
CT: control target
= control target key end

     0   :  { %s3102_s0 = inlined_call_operand.vmem [shape: f32[2,16,64], index: 0, kind: input, shape index: {}]   ;;  %s3103_s1 = inlined_call_operand.vmem [shape: f32[2,1,64], index: 1, kind: input, shape index: {}]   ;;  %s3104_s2 = inlined_call_operand.vmem [shape: f32[2,1,64], index: 2, kind: input, shape index: {}]   ;;  %s3105_s3 = inlined_call_operand.vmem [shape: bf16[2,64,192], index: 3, kind: input, shape index: {}]   ;;  %s3106_s4 = inlined_call_operand.vmem [shape: f32[2,1,192], index: 4, kind: input, shape index: {}]   ;;  %s3107_s5 = inlined_call_operand.vmem [shape: bf16[2,64,64], index: 5, kind: input, shape index: {}]   ;;  %s3108_s6 = inlined_call_operand.vmem [shape: f32[2,1,64], index: 6, kind: input, shape index: {}]   ;;  %s3109_s7 = inlined_call_operand.vmem [shape: f32[2,1,64], index: 7, kind: input, shape index: {}]   ;;  %s3110_s8 = inlined_call_operand.vmem [shape: f32[2,1,64], index: 8, kind: input, shape index: {}]   ;;  %s3111_s9 = inlined_call_operand.vmem [shape: bf16[2,64,256], index: 9, kind: input, shape index: {}]   ;;  %s3112_s10 = inlined_call_operand.vmem [shape: f32[2,1,256], index: 10, kind: input, shape index: {}]   ;;  %s3113_s11 = inlined_call_operand.vmem [shape: bf16[2,256,64], index: 11, kind: input, shape index: {}]   ;;  %s3114_s12 = inlined_call_operand.vmem [shape: f32[2,1,64], index: 12, kind: input, shape index: {}]   ;;  %s3115_s13 = inlined_call_operand.vmem [shape: f32[1,64], index: 13, kind: input, shape index: {}]   ;;  %s3116_s14 = inlined_call_operand.vmem [shape: f32[1,64], index: 14, kind: input, shape index: {}]   ;;  %s3117_s15 = inlined_call_operand.hbm [shape: f32[2,16,64], index: 15, kind: output, shape index: {}]  }
   0x1   :  { %3133 = sst [smem:[#allocation18_spill]] %s3102_s0 }
   0x2   :  { %3134 = sst [smem:[#allocation19_spill]] %s3104_s2 }
   0x3   :  { %3135 = sst [smem:[#allocation20_spill]] %s3105_s3 }
   0x4   :  { %3136 = sst [smem:[#allocation21_spill]] %s3106_s4 }
   0x5   :  { %3137 = sst [smem:[#allocation22_spill]] %s3107_s5 }
   0x6   :  { %3138 = sst [smem:[#allocation23_spill]] %s3113_s11 }
   0x7   :  { %3139 = sst [smem:[#allocation24_spill]] %s3115_s13 }
   0x8   :  { %3140 = sst [smem:[#allocation25_spill]] %s3116_s14 }
   0x9   :  { %3141 = sst [smem:[#allocation26_spill]] %s3117_s15 }
   0xa   :  { %20 = vsyncpa [#allocation3], 0 }
   0xb   :  { %22 = vsyncpa [#allocation3 + $0x1], 0  ;;  %s2668_s18 = smov 0   ;;  %s2670_s19 = smov 0  }
   0xc   :  { %s2672_s20 = smov 0   ;;  %s2674_s21 = smov 0  }
   0xd   :  { %s2676_s22 = smov 0   ;;  %s2678_s23 = smov 0  }
   0xe   :  { %s2680_s24 = smov 0   ;;  %s2682_s25 = smov 0  }
   0xf LB: > { %3142 = sst [smem:[#allocation5_spill]] %s2545_s18  ;;  %s2095_s26 = sadd.s32 4294967295, %s2573_s25   ;;  %s2573_s25 = sphi %s2682_s25, %s28_s25   ;;  %s2569_s24 = sphi %s2680_s24, %s3187_s24   ;;  %s2565_s23 = sphi %s2678_s23, %s3186_s23   ;;  %s2561_s22 = sphi %s2676_s22, %s3185_s22   ;;  %s2557_s21 = sphi %s2674_s21, %s3184_s21   ;;  %s2553_s20 = sphi %s2672_s20, %s3183_s20   ;;  %s2549_s19 = sphi %s2670_s19, %s3182_s19   ;;  %s2545_s18 = sphi %s2668_s18, %s3181_s18  }
  0x10   : > { %3143 = sst [smem:[#allocation6_spill]] %s2549_s19  ;;  %s2096_s27 = sadd.s32 4294967294, %s2573_s25  }
  0x11   : > { %3144 = sst [smem:[#allocation7_spill]] %s2553_s20  ;;  %s37_s28 = sadd.s32 1, %s2565_s23 }
  0x12   : > { %3145 = sst [smem:[#allocation8_spill]] %s2557_s21  ;;  %p38_p0 = scmp.ge.s32.totalorder %s37_s28, 2 }
  0x13   : > { %3146 = sst [smem:[#allocation9_spill]] %s2561_s22  ;;  %s40_s29 = sadd.s32 1, %s2569_s24 }
  0x14   : > { %3147 = sst [smem:[#allocation10_spill]] %s2565_s23  ;;  %p437_p1 = scmp.ne.s32.totalorder %s2553_s20, %s2549_s19 }
  0x15   : > { %3148 = sst [smem:[#allocation11_spill]] %s2569_s24  ;;  %p438_p2 = scmp.eq.s32.totalorder %s2095_s26, 3 }
  0x16   : > { %3149 = sst [smem:[#allocation12_spill]] %s2573_s25  ;;  %s3189_s28 = smov (%p38_p0, %s37_s28), 0 }
  0x17   : > { %3150 = sst [smem:[#allocation13_spill]] %s3189_s28  ;;  %s3191_s29 = smov (!%p38_p0, %s40_s29), %s2569_s24 }
  0x18   : > { %p2717_p3 = por %p438_p2, %p437_p1  ;;  %p443_p4 = scmp.ne.s32.totalorder %s2549_s19, %s2545_s18 }
  0x19   : > { %p42_p5 = scmp.ge.s32.totalorder %s3191_s29, 2  ;;  %p444_p6 = scmp.eq.s32.totalorder %s2096_s27, 3 }
  0x1a   : > { %s3151_s30 = scalar_select %p2717_p3, 1, 0 }
  0x1b   : > { %p2099_p7 = scmp.ge.s32.totalorder %s2573_s25, 1  ;;  %p558_p8 = scmp.lt.s32.totalorder %s2573_s25, 5 }
  0x1c   : > { %3152 = sst [smem:[#allocation14_spill]] %s3151_s30  ;;  %s3193_s29 = smov (%p42_p5, %s3191_s29), 0 }
  0x1d   : > { %3153 = sst [smem:[#allocation15_spill]] %s3193_s29  ;;  %p2727_p9 = por %p444_p6, %p443_p4 }
  0x1e   : > { %p559_p10 = pnand %p2099_p7, %p558_p8  ;;  %s424_s17 = ssub.s32 %s2569_s24, %s3193_s29 }
  0x1f   : > { %s3154_s16 = scalar_select %p2727_p9, 1, 0 }
  0x20   : > { %s427_s26 = sadd.s32 1, %s2553_s20  ;;  %p425_p11 = scmp.eq.s32.totalorder %s424_s17, 0 }
  0x21   : > { %3155 = sst [smem:[#allocation16_spill]] %s3154_s16  ;;  %562 = sbr.rel (%p559_p10) target bundleno = 2842 (0xb1a), region = 80 }
  0x22   : > { %s2735_s28 = scalar_select %p425_p11, %s2553_s20, %s427_s26  }
  0x23   : > { %s3123_s27 = sand.u32 (!%p559_p10), 1, %s2549_s19   ;;  %p652_p12 = scmp.lt.s32.totalorder (!%p559_p10), %s2561_s22, 1 }
  0x24   : > { %3156 = sst [smem:[#allocation17_spill]] %s2735_s28  ;;  %s2100_s23 = sshll.u32 (!%p559_p10), %s3123_s27, 4 }
  0x25   : > { %p657_p13 = scmp.lt.s32.totalorder (!%p559_p10), %s2557_s21, 1  ;;  %s3157_s0 = sld [smem:[#allocation18_spill]] (!%p559_p10) }
  0x26   : > { %s3159_s3 = sld [smem:[#allocation20_spill]] (!%p559_p10)  ;;  %s3160_s4 = sld [smem:[#allocation21_spill]] (!%p559_p10) }
  0x27   : > { %s3161_s5 = sld [smem:[#allocation22_spill]] (!%p559_p10) }
  0x28   : > { %s653_s18 = scalar_select %p652_p12, %s2561_s22, 1 }
  0x29   : > { %s2744_s16 = scalar_select %p657_p13, %s2557_s21, 1 }
  0x2a   : > { %s2176_s17 = sshll.u32 %s653_s18, 4 }
  0x2b   : > { %s656_s24 = scalar_lea.vmem %s3157_s0, %s2176_s17  ;;  %s2177_s19 = sshll.u32 %s2744_s16, 6 }
  0x2c   : > { %s2761_s13 = scalar_lea.vmem %s3159_s3, %s2177_s19  ;;  %s2105_s18 = sshll.u32 %s2744_s16, 1 }
  0x2d   : > { %s2767_s29 = scalar_lea.vmem %s3160_s4, %s2105_s18  ;;  %s2178_s17 = sshll.u32 %s2744_s16, 5 }
  0x2e   : > { %s2773_s27 = scalar_lea.vmem %s3161_s5, %s2178_s17  ;;  %s685_s11 = scalar_lea.vmem %s3110_s8, %s2744_s16 }
  0x2f   : > { %s2790_s2 = scalar_lea.vmem %s3111_s9, %s2177_s19  ;;  %s2795_s28 = scalar_lea.vmem %s3112_s10, %s2105_s18 }
  0x30   : > { %s2180_s15 = sshll.u32 %s2744_s16, 7  ;;  %s702_s20 = scalar_lea.vmem %s3114_s12, %s2744_s16 }
  0x31   : > { %s3162_s5 = sld [smem:[#allocation23_spill]]  ;;  %s2807_s3 = scalar_lea.vmem [#allocation2], %s2100_s23 }
  0x32   : > { %s3163_s4 = sld [smem:[#allocation8_spill]] }
  0x37   : > { %s2805_s0 = scalar_lea.vmem %s3162_s5, %s2180_s15 }
  0x38   : > { %p2113_p0 = scmp.ne.s32.totalorder %s3163_s4, 0 }
  0x39   : > { %v708_v0 = vld [vmem:[%s656_s24] sm:$0xff] (!%p2113_p0)  ;;  %vm710_vm0 = vcmask (!%p2113_p0), 523264   ;;  %v709_v1 = vld [vmem:[%s656_s24 + $0x8] sm:$0xff] (!%p2113_p0) }
  0x3a   : > { %707 = sbr.rel (%p2113_p0) target bundleno = 65 (0x41), region = 84  ;;  %711 = vst.msk [vmem:[%s2807_s3] sm:$0xff] (!%p2113_p0), %vm710_vm0, %v708_v0  ;;  %712 = vst.msk [vmem:[%s2807_s3 + $0x8] sm:$0xff] (!%p2113_p0), %vm710_vm0, %v709_v1 }
  0x41 PF: > { %v2813_v2 = vld [vmem:[%s2807_s3] sm:$0xff]  ;;  %vm717_vm1 = vcmask 523264   ;;  %v2816_v3 = vld [vmem:[%s2807_s3 + $0x8] sm:$0xff]  ;;  %v2575_v24 = vmov 0   ;;  %s3165_s30 = sld [smem:[#allocation19_spill]]  ;;  %v772_v42 = vlaneseq  ;;  %v2576_v46 = vmov 0.0   ;;  %s3167_s4 = scalar_lea.vmem %s3108_s6, %s2744_s16 }
  0x42   : > { %v718_v4 = vsel %vm717_vm1, %v2813_v2, 0.0  ;;  %v721_v5 = vsel %vm717_vm1, %v2816_v3, 0.0  ;;  %v2383_v16 = vld [vmem:[%s2761_s13 + $0x4] ss:$8 sps:$4 sm:$0xff]   ;;  %v2385_v17 = vld [vmem:[%s2761_s13] ss:$8 sps:$4 sm:$0xff]   ;;  %857 = vmatprep.mubr.bf16.mxu1 %v2575_v24  ;;  %2237 = vmatprep.subr.bf16.mxu0 %v2576_v46  ;;  %s3168_s19 = scalar_lea.vmem %s3109_s7, %s2744_s16 }
  0x43   : > { %719 = vadd.xlane.f32.xlu0 %v718_v4  ;;  %825 = vmatprep.subr.bf16.mxu1 %v2383_v16  ;;  %v2386_v18 = vld [vmem:[%s2761_s13 + $0x14] ss:$8 sps:$4 sm:$0xff]   ;;  %v2388_v19 = vld [vmem:[%s2761_s13 + $0x10] ss:$8 sps:$4 sm:$0xff]   ;;  %v2389_v20 = vld [vmem:[%s2761_s13 + $0x24] ss:$8 sps:$4 sm:$0xff]  }
  0x44   : > { %826 = vmatpush1.bf16.msra.mxu1 %v2385_v17  ;;  %v2391_v21 = vld [vmem:[%s2761_s13 + $0x20] ss:$8 sps:$4 sm:$0xff]   ;;  %v2392_v22 = vld [vmem:[%s2761_s13 + $0x34] ss:$8 sps:$4 sm:$0xff]   ;;  %v2394_v23 = vld [vmem:[%s2761_s13 + $0x30] ss:$8 sps:$4 sm:$0xff]   ;;  %s3164_s13 = scalar_lea.vmem %s3103_s1, %s2744_s16 }
  0x45   : > { %827 = vmatprep.subr.bf16.mxu1 %v2386_v18  ;;  %v2114_v33 = vld [vmem:[%s3164_s13] ss:$0 sm:$0xff]  ;;  %v2846_v43 = vshrl.u32 %v772_v42, 7  ;;  %vm2577_vm2 = vmmov 0   ;;  %s2579_s22 = smov 64   ;;  %s2580_s21 = smov 96  }
  0x46   : > { %v770_v45 = vld [vmem:[%s2767_s29] sm:$0x3]  ;;  %2239 = vmatprep.mubr.msk.bf16.mxu0 %vm2577_vm2, %v2576_v46  ;;  %s2578_s29 = smov 48   ;;  %s2581_s26 = smov 112   ;;  %vm876_vm3 = vcmask 130048   ;;  %vm1382_vm4 = vcmask 261120  }
  0x47   : > { %722 = vadd.xlane.f32.xlu0 %v721_v5  ;;  %s3166_s18 = scalar_lea.vmem %s3165_s30, %s2744_s16  ;;  %v774_v44 = vsub.s32 0, %v2846_v43  ;;  %v778_v47 = vsub.s32 1, %v2846_v43  ;;  %s2582_s17 = smov 80   ;;  %vm1385_vm5 = vcmask 392192  }
  0x48   : > { %828 = vmatpush1.bf16.msra.mxu1 %v2388_v19  ;;  %v2115_v37 = vld [vmem:[%s3166_s18] ss:$0 sm:$0xff]  ;;  %s2583_s15 = smov 32   ;;  %s2584_s25 = smov 16  }
  0x49   : > { %829 = vmatprep.subr.bf16.mxu1 %v2389_v20  ;;  %v775_v48 = vrot.slane %v770_v45, %v774_v44  ;;  %v779_v50 = vrot.slane %v770_v45, %v778_v47 }
  0x4c   : > { %830 = vmatpush1.bf16.msra.mxu1 %v2391_v21 }
  0x4d   : > { %831 = vmatprep.subr.bf16.mxu1 %v2392_v22 }
  0x50   : > { %832 = vmatpush1.bf16.msra.mxu1 %v2394_v23 }
  0x51   : > { %2225 = vmatprep.subr.bf16.mxu1 %v2576_v46 }
  0xd0   : > { %v720_v6 = vpop.xlane.xlu0 %719 }
  0xd1   : > { %v725_v7 = vmul.f32 0.015625, %v720_v6 }
  0xd3   : > { %v727_v8 = vsub.f32 %v2813_v2, %v725_v7 }
  0xd4   : > { %v723_v9 = vpop.xlane.xlu0 %722 }
  0xd5   : > { %v726_v10 = vmul.f32 0.015625, %v723_v9  ;;  %v729_v11 = vmul.f32 %v727_v8, %v727_v8 }
  0xd7   : > { %v728_v12 = vsub.f32 %v2816_v3, %v726_v10  ;;  %v731_v13 = vsel %vm717_vm1, %v729_v11, 0.0 }
  0xd8   : > { %732 = vadd.xlane.f32.xlu1 %v731_v13 }
  0xd9   : > { %v730_v14 = vmul.f32 %v728_v12, %v728_v12 }
  0xdb   : > { %v734_v15 = vsel %vm717_vm1, %v730_v14, 0.0 }
  0xdc   : > { %735 = vadd.xlane.f32.xlu1 %v734_v15 }
 0x165   : > { %v733_v25 = vpop.xlane.xlu1 %732 }
 0x166   : > { %v737_v26 = vmul.f32 0.015625, %v733_v25 }
 0x168   : > { %v739_v27 = vadd.f32 1e-05, %v737_v26 }
 0x169   : > { %v736_v28 = vpop.xlane.xlu1 %735 }
 0x16a   : > { %2427 = vrsqrt.f32 %v739_v27  ;;  %v738_v29 = vmul.f32 0.015625, %v736_v28 }
 0x16c   : > { %v740_v30 = vadd.f32 1e-05, %v738_v29 }
 0x16e   : > { %2429 = vrsqrt.f32 %v740_v30 }
 0x174   : > { %v2428_v31 = vpop.eup %2427 }
 0x175   : > { %v743_v32 = vmul.f32 %v2428_v31, %v727_v8 }
 0x177   : > { %v751_v36 = vmul.f32 %v2114_v33, %v743_v32 }
 0x178   : > { %v2430_v34 = vpop.eup %2429 }
 0x179   : > { %v744_v35 = vmul.f32 %v2430_v34, %v728_v12  ;;  %v759_v39 = vadd.f32 %v2115_v37, %v751_v36 }
 0x17b   : > { %v752_v38 = vmul.f32 %v2114_v33, %v744_v35 }
 0x17d   : > { %v760_v40 = vadd.f32 %v2115_v37, %v752_v38 }
 0x17f   : > { %v761_v41 = vpack.c.bf16 %v760_v40, %v759_v39 }
 0x181   : > { %2124 = vmatmul.mubr.msk.bf16.vlgmr.msra.gmra.mrb[0].mxu1 %vm717_vm1, %v761_v41 }
 0x182   : > { %2227 = vmatprep.mubr.msk.bf16.mxu1 %vm2577_vm2, %v2576_v46 }
 0x254   : > { %v859_v49 = vpop.f32.mrb[0].mxu1 }
 0x255   : > { %v860_v51 = vadd.f32 %v859_v49, %v775_v48  ;;  %v861_v52 = vpop.f32.mrb[1].mxu1 }
 0x256   : > { %v863_v53 = vpop.f32.mrb[2].mxu1  ;;  %v862_v56 = vadd.f32 %v861_v52, %v779_v50 }
 0x257   : > { %v864_v54 = vadd.f32 %v863_v53, %v775_v48  ;;  %v865_v55 = vpop.f32.mrb[3].mxu1  ;;  %v868_v58 = vmul.f32 0.25, %v860_v51 }
 0x258   : > { %v866_v57 = vadd.f32 %v865_v55, %v779_v50 }
 0x259   : > { %v869_v59 = vmul.f32 0.25, %v864_v54  ;;  %v871_v60 = vpack.c.bf16 %v864_v54, %v860_v51 }
 0x25a   : > { %v2861_v61 = vpack.c.bf16 %v866_v57, %v862_v56 }
 0x25b   : > { %v870_v62 = vpack.c.bf16 %v869_v59, %v868_v58  ;;  %994 = vrot.lane.b32.xlu1 %v871_v60, %s2578_s29  ;;  %874 = vrot.lane.b32.xlu0 %v871_v60, %s2579_s22 }
 0x25f   : > { %1114 = vrot.lane.b32.xlu0 %v870_v62, %s2580_s21  ;;  %992 = vrot.lane.b32.xlu1 %v870_v62, %s2581_s26 }
 0x263   : > { %1235 = vrot.lane.b32.xlu0 %v870_v62, %s2582_s17  ;;  %1116 = vrot.lane.b32.xlu1 %v871_v60, %s2583_s15 }
 0x267   : > { %1237 = vrot.lane.b32.xlu1 %v871_v60, %s2584_s25 }
 0x2cd   : > { %v995_v63 = vpop.permute.xlu1 %994  ;;  %v875_v0 = vpop.permute.xlu0 %874 }
 0x2ce   : > { %v881_v1 = vsel %vm876_vm3, %v875_v0, 0  ;;  %v1000_v4 = vsel %vm876_vm3, %v995_v63, 0 }
 0x2cf   : > { %2226 = vmatpush3.bf16.xpose.msra.mxu1 %v881_v1  ;;  %2238 = vmatpush3.bf16.xpose.msra.mxu0 %v1000_v4 }
 0x2d0   : > { %2231 = vmatprep.subr.bf16.mxu1 %v2576_v46  ;;  %2249 = vmatprep.subr.bf16.mxu0 %v2576_v46 }
 0x2d1   : > { %v993_v5 = vpop.permute.xlu1 %992  ;;  %v1115_v9 = vpop.permute.xlu0 %1114 }
 0x2d5   : > { %v1117_v6 = vpop.permute.xlu1 %1116  ;;  %v1236_v11 = vpop.permute.xlu0 %1235 }
 0x2d6   : > { %v1122_v7 = vsel %vm876_vm3, %v1117_v6, 0  ;;  %2228 = vmatmul.mubr.msk.bf16.vlgmr.msra.gmra.mrb[4].mxu1 %vm876_vm3, %v870_v62  ;;  %2240 = vmatmul.mubr.msk.bf16.vlgmr.msra.gmra.mrb[0].mxu0 %vm876_vm3, %v993_v5 }
 0x2d7   : > { %2232 = vmatpush3.bf16.msra.mxu1 %v2861_v61  ;;  %2250 = vmatpush3.bf16.xpose.msra.mxu0 %v1122_v7 }
 0x2d8   : > { %2251 = vmatprep.mubr.msk.bf16.mxu0 %vm2577_vm2, %v2576_v46  ;;  %2261 = vmatprep.subr.bf16.mxu0 %v2576_v46 }
 0x2d9   : > { %2233 = vmatprep.mubr.msk.bf16.mxu1 %vm2577_vm2, %v2576_v46  ;;  %2243 = vmatprep.subr.bf16.mxu1 %v2576_v46  ;;  %v1238_v8 = vpop.permute.xlu1 %1237 }
 0x2da   : > { %v1243_v10 = vsel %vm876_vm3, %v1238_v8, 0 }
 0x2de   : > { %2252 = vmatmul.mubr.msk.bf16.vlgmr.msra.gmra.mrb[4].mxu0 %vm876_vm3, %v1115_v9 }
 0x2df   : > { %2262 = vmatpush3.bf16.xpose.msra.mxu0 %v1243_v10  ;;  %2263 = vmatprep.mubr.msk.bf16.mxu0 %vm2577_vm2, %v2576_v46 }
 0x2e0   : > { %2273 = vmatprep.subr.bf16.mxu0 %v2576_v46 }
 0x2e6   : > { %2264 = vmatmul.mubr.msk.bf16.vlgmr.msra.gmra.mrb[8].mxu0 %vm876_vm3, %v1236_v11 }
 0x2e7   : > { %2281 = vmatprep.mubr.msk.bf16.mxu0 %vm2577_vm2, %v2576_v46 }
 0x3a9   : > { %v917_v12 = vpop.f32.mrb[4].mxu1  ;;  %v1036_v13 = vpop.f32.mrb[0].mxu0 }
 0x3aa   : > { %v2229_v14 = vpop.f32.mrb[5].mxu1  ;;  %v2241_v15 = vpop.f32.mrb[1].mxu0  ;;  %v924_v16 = vsel %vm876_vm3, %v917_v12, -inf  ;;  %v1043_v22 = vsel %vm876_vm3, %v1036_v13, -inf }
 0x3ab   : > { %v1039_v17 = vpop.f32.mrb[2].mxu0  ;;  %925 = vmax.xlane.f32.xlu1 %v924_v16  ;;  %v920_v18 = vpop.f32.mrb[6].mxu1 }
 0x3ac   : > { %v2230_v19 = vpop.f32.mrb[7].mxu1  ;;  %v2242_v20 = vpop.f32.mrb[3].mxu0  ;;  %v927_v21 = vsel %vm876_vm3, %v920_v18, -inf  ;;  %v1046_v28 = vsel %vm876_vm3, %v1039_v17, -inf }
 0x3ad   : > { %928 = vmax.xlane.f32.xlu0 %v927_v21 }
 0x3b1   : > { %v2894_v23 = vpop.f32.mrb[4].mxu0  ;;  %1044 = vmax.xlane.f32.xlu0 %v1043_v22 }
 0x3b2   : > { %v2253_v25 = vpop.f32.mrb[5].mxu0  ;;  %v1165_v35 = vsel %vm876_vm3, %v2894_v23, -inf }
 0x3b3   : > { %v1161_v26 = vpop.f32.mrb[6].mxu0 }
 0x3b4   : > { %v2254_v27 = vpop.f32.mrb[7].mxu0  ;;  %v1168_v29 = vsel %vm876_vm3, %v1161_v26, -inf }
 0x3b5   : > { %1047 = vmax.xlane.f32.xlu0 %v1046_v28 }
 0x3b9   : > { %v2898_v30 = vpop.f32.mrb[8].mxu0  ;;  %1169 = vmax.xlane.f32.xlu0 %v1168_v29 }
 0x3ba   : > { %v2265_v31 = vpop.f32.mrb[9].mxu0  ;;  %v1286_v36 = vsel %vm876_vm3, %v2898_v30, -inf }
 0x3bb   : > { %v1282_v32 = vpop.f32.mrb[10].mxu0 }
 0x3bc   : > { %v2266_v33 = vpop.f32.mrb[11].mxu0  ;;  %1063 = vrot.lane.b32.xlu1 %v2861_v61, %s2581_s26  ;;  %v1289_v34 = vsel %vm876_vm3, %v1282_v32, -inf }
 0x3bd   : > { %1290 = vmax.xlane.f32.xlu0 %v1289_v34  ;;  %v2395_v33 = vld [vmem:[%s2773_s27] sm:$0xff]  }
 0x3be   : > { %2274 = vmatpush3.bf16.msra.mxu0 %v2395_v33 }
 0x3bf   : > { %2275 = vmatprep.subr.bf16.mxu0 %v2576_v46 }
 0x3d3   : > { %1184 = vrot.lane.b32.xlu0 %v2861_v61, %s2580_s21 }
 0x3e0   : > { %1166 = vmax.xlane.f32.xlu1 %v1165_v35 }
 0x3e4   : > { %1287 = vmax.xlane.f32.xlu1 %v1286_v36 }
 0x3f5   : > { %1305 = vrot.lane.b32.xlu1 %v2861_v61, %s2582_s17 }
 0x438   : > { %v926_v37 = vpop.xlane.xlu1 %925 }
 0x439   : > { %v930_v38 = vsub.f32 %v917_v12, %v926_v37 }
 0x43a   : > { %v929_v39 = vpop.xlane.xlu0 %928 }
 0x43b   : > { %v932_v40 = vmul.f32 1.442695, %v930_v38  ;;  %v931_v41 = vsub.f32 %v920_v18, %v929_v39 }
 0x43c   : > { %v1064_v61 = vpop.permute.xlu1 %1063 }
 0x43d   : > { %v934_v42 = vmul.f32 1.442695, %v931_v41  ;;  %2431 = vpow2.f32 %v932_v40 }
 0x43e   : > { %v1045_v45 = vpop.xlane.xlu0 %1044 }
 0x43f   : > { %2433 = vpow2.f32 %v934_v42  ;;  %v1049_v48 = vsub.f32 %v1036_v13, %v1045_v45 }
 0x441   : > { %v1051_v49 = vmul.f32 1.442695, %v1049_v48  ;;  %v2396_v48 = vld [vmem:[%s2773_s27 + $0x8] sm:$0xff]  }
 0x442   : > { %v1048_v50 = vpop.xlane.xlu0 %1047  ;;  %2276 = vmatpush3.bf16.msra.mxu0 %v2396_v48 }
 0x443   : > { %2435 = vpow2.f32 %v1051_v49  ;;  %v1050_v51 = vsub.f32 %v1039_v17, %v1048_v50  ;;  %2277 = vmatprep.subr.bf16.mxu0 %v2576_v46 }
 0x445   : > { %v1053_v52 = vmul.f32 1.442695, %v1050_v51  ;;  %v2397_v51 = vld [vmem:[%s2773_s27 + $0x10] sm:$0xff]  }
 0x446   : > { %v1170_v53 = vpop.xlane.xlu0 %1169  ;;  %2278 = vmatpush3.bf16.msra.mxu0 %v2397_v51 }
 0x447   : > { %2437 = vpow2.f32 %v1053_v52  ;;  %v1172_v54 = vsub.f32 %v1161_v26, %v1170_v53  ;;  %v2432_v55 = vpop.eup %2431  ;;  %2279 = vmatprep.subr.bf16.mxu0 %v2576_v46 }
 0x448   : > { %v936_v26 = vsel %vm876_vm3, %v2432_v55, 0.0 }
 0x449   : > { %v2434_v56 = vpop.eup %2433  ;;  %v1175_v57 = vmul.f32 1.442695, %v1172_v54 }
 0x44a   : > { %v1291_v58 = vpop.xlane.xlu0 %1290  ;;  %v942_v59 = vpack.c.bf16 %v2434_v56, %v2432_v55  ;;  %v939_v11 = vsel %vm876_vm3, %v2434_v56, 0.0 }
 0x44b   : > { %2439 = vpow2.f32 %v1175_v57  ;;  %v1293_v60 = vsub.f32 %v1282_v32, %v1291_v58 }
 0x44c   : > { %2234 = vmatmul.mubr.msk.bf16.vlgmr.msra.gmra.mrb[8].mxu1 %vm876_vm3, %v942_v59 }
 0x44d   : > { %v2436_v62 = vpop.eup %2435  ;;  %v1296_v63 = vmul.f32 1.442695, %v1293_v60  ;;  %2244 = vmatpush3.bf16.msra.mxu1 %v1064_v61  ;;  %2245 = vmatprep.mubr.msk.bf16.mxu1 %vm2577_vm2, %v2576_v46  ;;  %v2398_v60 = vld [vmem:[%s2773_s27 + $0x18] sm:$0xff]  }
 0x44e   : > { %v1055_v0 = vsel %vm876_vm3, %v2436_v62, 0.0  ;;  %2255 = vmatprep.subr.bf16.mxu1 %v2576_v46  ;;  %v1185_v6 = vpop.permute.xlu0 %1184  ;;  %2280 = vmatpush3.bf16.msra.mxu0 %v2398_v60  ;;  %v2410_v60 = vld [vmem:[%s2790_s2 + $0x34] ss:$8 sps:$4 sm:$0xff]  }
 0x44f   : > { %2441 = vpow2.f32 %v1296_v63  ;;  %1056 = vadd.xlane.f32.xlu1 %v1055_v0 }
 0x451   : > { %v2438_v1 = vpop.eup %2437 }
 0x452   : > { %v1058_v4 = vsel %vm876_vm3, %v2438_v1, 0.0  ;;  %v1061_v5 = vpack.c.bf16 %v2438_v1, %v2436_v62 }
 0x453   : > { %1059 = vadd.xlane.f32.xlu0 %v1058_v4 }
 0x454   : > { %2246 = vmatmul.mubr.msk.bf16.vlgmr.msra.gmra.mrb[12].mxu1 %vm876_vm3, %v1061_v5 }
 0x455   : > { %v2440_v7 = vpop.eup %2439  ;;  %2256 = vmatpush3.bf16.msra.mxu1 %v1185_v6  ;;  %2257 = vmatprep.mubr.msk.bf16.mxu1 %vm2577_vm2, %v2576_v46 }
 0x456   : > { %v1180_v8 = vsel %vm876_vm3, %v2440_v7, 0.0  ;;  %2267 = vmatprep.subr.bf16.mxu1 %v2576_v46 }
 0x457   : > { %1181 = vadd.xlane.f32.xlu1 %v1180_v8 }
 0x459   : > { %v2442_v9 = vpop.eup %2441 }
 0x45a   : > { %v1301_v10 = vsel %vm876_vm3, %v2442_v9, 0.0 }
 0x45b   : > { %1302 = vadd.xlane.f32.xlu1 %v1301_v10 }
 0x45f   : > { %940 = vadd.xlane.f32.xlu1 %v939_v11 }
 0x46d   : > { %v1167_v12 = vpop.xlane.xlu1 %1166 }
 0x46e   : > { %v1171_v13 = vsub.f32 %v2894_v23, %v1167_v12 }
 0x470   : > { %v1173_v14 = vmul.f32 1.442695, %v1171_v13 }
 0x471   : > { %v1288_v15 = vpop.xlane.xlu1 %1287 }
 0x472   : > { %2443 = vpow2.f32 %v1173_v14  ;;  %v1292_v16 = vsub.f32 %v2898_v30, %v1288_v15 }
 0x474   : > { %v1294_v17 = vmul.f32 1.442695, %v1292_v16 }
 0x475   : > { %v1306_v21 = vpop.permute.xlu1 %1305 }
 0x476   : > { %2445 = vpow2.f32 %v1294_v17 }
 0x47c   : > { %v2444_v18 = vpop.eup %2443 }
 0x47d   : > { %v1177_v19 = vsel %vm876_vm3, %v2444_v18, 0.0  ;;  %v1183_v20 = vpack.c.bf16 %v2440_v7, %v2444_v18 }
 0x47e   : > { %1178 = vadd.xlane.f32.xlu0 %v1177_v19 }
 0x47f   : > { %2258 = vmatmul.mubr.msk.bf16.vlgmr.msra.gmra.mrb[16].mxu1 %vm876_vm3, %v1183_v20 }
 0x480   : > { %v2446_v22 = vpop.eup %2445  ;;  %2268 = vmatpush3.bf16.msra.mxu1 %v1306_v21  ;;  %2269 = vmatprep.mubr.msk.bf16.mxu1 %vm2577_vm2, %v2576_v46 }
 0x481   : > { %v1298_v23 = vsel %vm876_vm3, %v2446_v22, 0.0  ;;  %v1304_v25 = vpack.c.bf16 %v2442_v9, %v2446_v22 }
 0x482   : > { %1299 = vadd.xlane.f32.xlu0 %v1298_v23 }
 0x486   : > { %937 = vadd.xlane.f32.xlu0 %v936_v26 }
 0x487   : > { %2270 = vmatmul.mubr.msk.bf16.vlgmr.msra.gmra.mrb[20].mxu1 %vm876_vm3, %v1304_v25 }
 0x488   : > { %1614 = vmatprep.mubr.bf16.mxu1 %v2575_v24 }
 0x4dc   : > { %v1057_v27 = vpop.xlane.xlu1 %1056 }
 0x4dd   : > { %2447 = vrcp.f32 %v1057_v27 }
 0x4e0   : > { %v1060_v28 = vpop.xlane.xlu0 %1059 }
 0x4e1   : > { %2449 = vrcp.f32 %v1060_v28 }
 0x4e4   : > { %v1182_v42 = vpop.xlane.xlu1 %1181 }
 0x4e5   : > { %2451 = vrcp.f32 %v1182_v42 }
 0x4e7   : > { %v2448_v35 = vpop.eup %2447 }
 0x4e8   : > { %v1303_v49 = vpop.xlane.xlu1 %1302 }
 0x4eb   : > { %v2450_v24 = vpop.eup %2449 }
 0x4ec   : > { %v941_v9 = vpop.xlane.xlu1 %940 }
 0x4ef   : > { %v2452_v53 = vpop.eup %2451 }
 0x50b   : > { %v1179_v45 = vpop.xlane.xlu0 %1178 }
 0x50c   : > { %2453 = vrcp.f32 %v1179_v45 }
 0x50d   : > { %2455 = vrcp.f32 %v1303_v49 }
 0x50f   : > { %v1300_v50 = vpop.xlane.xlu0 %1299 }
 0x510   : > { %2457 = vrcp.f32 %v1300_v50 }
 0x513   : > { %v938_v46 = vpop.xlane.xlu0 %937 }
 0x514   : > { %2459 = vrcp.f32 %v938_v46 }
 0x515   : > { %2461 = vrcp.f32 %v941_v9 }
 0x516   : > { %v2454_v55 = vpop.eup %2453 }
 0x517   : > { %v2456_v63 = vpop.eup %2455 }
 0x51a   : > { %v2458_v1 = vpop.eup %2457 }
 0x51e   : > { %v2460_v12 = vpop.eup %2459 }
 0x51f   : > { %v2934_v29 = vpop.f32.mrb[8].mxu1  ;;  %v2462_v15 = vpop.eup %2461 }
 0x520   : > { %v2235_v30 = vpop.f32.mrb[9].mxu1  ;;  %v989_v18 = vmul.f32 %v2460_v12, %v2934_v29  ;;  %v2133_v29 = vld [vmem:[%s3167_s4] ss:$0 sm:$0xff] }
 0x521   : > { %v2936_v31 = vpop.f32.mrb[10].mxu1 }
 0x522   : > { %v2236_v32 = vpop.f32.mrb[11].mxu1  ;;  %v990_v19 = vmul.f32 %v2462_v15, %v2936_v31 }
 0x527   : > { %v1103_v34 = vpop.f32.mrb[12].mxu1 }
 0x528   : > { %v2247_v36 = vpop.f32.mrb[13].mxu1  ;;  %v1112_v38 = vmul.f32 %v2448_v35, %v1103_v34 }
 0x529   : > { %v1106_v37 = vpop.f32.mrb[14].mxu1 }
 0x52a   : > { %v1113_v39 = vmul.f32 %v2450_v24, %v1106_v37  ;;  %v2248_v40 = vpop.f32.mrb[15].mxu1 }
 0x52c   : > { %v2368_v41 = vpack.i.bf16 %v1113_v39, %v1112_v38 }
 0x52e   : > { %2369 = vrot.lane.b32.xlu0 %v2368_v41, %s2584_s25 }
 0x552   : > { %v1224_v52 = vpop.f32.mrb[16].mxu1 }
 0x553   : > { %v2259_v54 = vpop.f32.mrb[17].mxu1  ;;  %v1233_v57 = vmul.f32 %v2454_v55, %v1224_v52  ;;  %v2404_v55 = vld [vmem:[%s2790_s2 + $0x14] ss:$8 sps:$4 sm:$0xff]  }
 0x554   : > { %v1227_v56 = vpop.f32.mrb[18].mxu1  ;;  %v2399_v54 = vld [vmem:[%s2790_s2] ss:$8 sps:$4 sm:$0xff]  }
 0x555   : > { %v1234_v58 = vmul.f32 %v2452_v53, %v1227_v56  ;;  %v2260_v59 = vpop.f32.mrb[19].mxu1  ;;  %v2401_v53 = vld [vmem:[%s2790_s2 + $0x4] ss:$8 sps:$4 sm:$0xff]   ;;  %v2402_v56 = vld [vmem:[%s2790_s2 + $0x10] ss:$8 sps:$4 sm:$0xff]  }
 0x556   : > { %1582 = vmatprep.subr.bf16.mxu1 %v2401_v53  ;;  %v2408_v59 = vld [vmem:[%s2790_s2 + $0x30] ss:$8 sps:$4 sm:$0xff]  }
 0x557   : > { %v2373_v61 = vpack.i.bf16 %v1234_v58, %v1233_v57  ;;  %1583 = vmatpush1.bf16.msra.mxu1 %v2399_v54  ;;  %v2407_v57 = vld [vmem:[%s2790_s2 + $0x24] ss:$8 sps:$4 sm:$0xff]   ;;  %v2405_v58 = vld [vmem:[%s2790_s2 + $0x20] ss:$8 sps:$4 sm:$0xff]  }
 0x558   : > { %1584 = vmatprep.subr.bf16.mxu1 %v2404_v55 }
 0x559   : > { %2374 = vrot.lane.b32.xlu1 %v2373_v61, %s2583_s15  ;;  %v2411_v61 = vld [vmem:[%s2805_s0 + $0x40] sm:$0xff]  }
 0x55a   : > { %v1345_v62 = vpop.f32.mrb[20].mxu1  ;;  %2203 = vmatprep.subr.bf16.mxu0 %v2411_v61 }
 0x55b   : > { %v2271_v0 = vpop.f32.mrb[21].mxu1  ;;  %v1354_v5 = vmul.f32 %v2458_v1, %v1345_v62  ;;  %1585 = vmatpush1.bf16.msra.mxu1 %v2402_v56  ;;  %v2412_v62 = vld [vmem:[%s2805_s0] sm:$0xff]  }
 0x55c   : > { %v1348_v4 = vpop.f32.mrb[22].mxu1  ;;  %1586 = vmatprep.subr.bf16.mxu1 %v2407_v57  ;;  %v2414_v0 = vld [vmem:[%s2805_s0 + $0x8] sm:$0xff]  }
 0x55d   : > { %v1355_v6 = vmul.f32 %v2456_v63, %v1348_v4  ;;  %v2272_v7 = vpop.f32.mrb[23].mxu1  ;;  %v2413_v63 = vld [vmem:[%s2805_s0 + $0x48] sm:$0xff]  }
 0x55f   : > { %v2378_v8 = vpack.i.bf16 %v1355_v6, %v1354_v5  ;;  %1587 = vmatpush1.bf16.msra.mxu1 %v2405_v58 }
 0x560   : > { %1588 = vmatprep.subr.bf16.mxu1 %v2410_v60 }
 0x561   : > { %2379 = vrot.lane.b32.xlu1 %v2378_v8, %s2578_s29 }
 0x563   : > { %1589 = vmatpush1.bf16.msra.mxu1 %v2408_v59 }
 0x5a0   : > { %v2370_v10 = vpop.permute.xlu0 %2369 }
 0x5a1   : > { %v2372_v13 = vunpack.i.h.bf16 %v2370_v10  ;;  %v2371_v14 = vunpack.i.l.bf16 %v2370_v10  ;;  %v2139_v10 = vld [vmem:[%s3168_s19] ss:$0 sm:$0xff] }
 0x5a3   : > { %v1381_v21 = vsel %vm876_vm3, %v990_v19, %v2372_v13  ;;  %v1380_v22 = vsel %vm876_vm3, %v989_v18, %v2371_v14  ;;  %v2140_v14 = vld [vmem:[%s685_s11] ss:$0 sm:$0xff]  ;;  %v2415_v19 = vld [vmem:[%s2805_s0 + $0x50] sm:$0xff]  }
 0x5cb   : > { %v2375_v11 = vpop.permute.xlu1 %2374 }
 0x5cc   : > { %v2377_v16 = vunpack.i.h.bf16 %v2375_v11  ;;  %v2376_v17 = vunpack.i.l.bf16 %v2375_v11 }
 0x5ce   : > { %v1384_v26 = vsel %vm1382_vm4, %v1381_v21, %v2377_v16  ;;  %v1383_v27 = vsel %vm1382_vm4, %v1380_v22, %v2376_v17  ;;  %v2417_v21 = vld [vmem:[%s2805_s0 + $0x58] sm:$0xff]  }
 0x5cf   : > { %v2418_v22 = vld [vmem:[%s2805_s0 + $0x18] sm:$0xff]  }
 0x5d3   : > { %v2380_v20 = vpop.permute.xlu1 %2379 }
 0x5d4   : > { %v2382_v23 = vunpack.i.h.bf16 %v2380_v20  ;;  %v2381_v25 = vunpack.i.l.bf16 %v2380_v20  ;;  %v2416_v20 = vld [vmem:[%s2805_s0 + $0x10] sm:$0xff]  }
 0x5d6   : > { %v1387_v28 = vsel %vm1385_vm5, %v1384_v26, %v2382_v23  ;;  %v1386_v30 = vsel %vm1385_vm5, %v1383_v27, %v2381_v25  ;;  %v2419_v23 = vld [vmem:[%s2805_s0 + $0x60] sm:$0xff]   ;;  %v2421_v26 = vld [vmem:[%s2805_s0 + $0x68] sm:$0xff]  }
 0x5d7   : > { %v1388_v32 = vpack.c.bf16 %v1387_v28, %v1386_v30  ;;  %v2420_v25 = vld [vmem:[%s2805_s0 + $0x20] sm:$0xff]   ;;  %v2422_v27 = vld [vmem:[%s2805_s0 + $0x28] sm:$0xff]   ;;  %v2423_v28 = vld [vmem:[%s2805_s0 + $0x70] sm:$0xff]  }
 0x5d8   : > { %v2424_v30 = vld [vmem:[%s2805_s0 + $0x30] sm:$0xff]  }
 0x5d9   : > { %2282 = vmatmul.mubr.msk.bf16.vlgmr.msra.gmra.mrb[12].mxu0 %vm717_vm1, %v1388_v32  ;;  %v2425_v32 = vld [vmem:[%s2805_s0 + $0x78] sm:$0xff]  }
 0x5da   : > { %2204 = vmatpush3.bf16.msra.mxu0 %v2412_v62 }
 0x5db   : > { %2205 = vmatprep.subr.bf16.mxu0 %v2413_v63 }
 0x5de   : > { %2206 = vmatpush3.bf16.msra.mxu0 %v2414_v0 }
 0x5df   : > { %2207 = vmatprep.subr.bf16.mxu0 %v2415_v19 }
 0x5e2   : > { %2208 = vmatpush3.bf16.msra.mxu0 %v2416_v20 }
 0x5e3   : > { %2209 = vmatprep.subr.bf16.mxu0 %v2417_v21 }
 0x5e6   : > { %2210 = vmatpush3.bf16.msra.mxu0 %v2418_v22 }
 0x5e7   : > { %2211 = vmatprep.subr.bf16.mxu0 %v2419_v23 }
 0x5ea   : > { %2212 = vmatpush3.bf16.msra.mxu0 %v2420_v25 }
 0x5eb   : > { %2213 = vmatprep.subr.bf16.mxu0 %v2421_v26 }
 0x5ee   : > { %2214 = vmatpush3.bf16.msra.mxu0 %v2422_v27 }
 0x5ef   : > { %2215 = vmatprep.subr.bf16.mxu0 %v2423_v28 }
 0x5f2   : > { %2216 = vmatpush3.bf16.msra.mxu0 %v2424_v30 }
 0x5f3   : > { %2217 = vmatprep.subr.bf16.mxu0 %v2425_v32 }
 0x6ac   : > { %v1465_v31 = vpop.f32.mrb[12].mxu0 }
 0x6ad   : > { %v1466_v33 = vadd.f32 %v2133_v29, %v1465_v31  ;;  %v2283_v34 = vpop.f32.mrb[13].mxu0  ;;  %v1527_v31 = vld [vmem:[%s2795_s28] sm:$0x3] }
 0x6ae   : > { %v1468_v35 = vpop.f32.mrb[14].mxu0  ;;  %v1536_v34 = vrot.slane %v1527_v31, %v778_v47 }
 0x6af   : > { %v2959_v36 = vadd.f32 %v1466_v33, %v2813_v2  ;;  %v1469_v24 = vadd.f32 %v2133_v29, %v1468_v35  ;;  %v2284_v37 = vpop.f32.mrb[15].mxu0  ;;  %v2426_v29 = vld [vmem:[%s2805_s0 + $0x38] sm:$0xff]   ;;  %v1532_v33 = vrot.slane %v1527_v31, %v774_v44  ;;  %s3169_s0 = sld [smem:[#allocation8_spill]] }
 0x6b0   : > { %2218 = vmatpush3.bf16.msra.mxu0 %v2426_v29 }
 0x6b1   : > { %v2962_v38 = vadd.f32 %v1469_v24, %v2816_v3  ;;  %v1476_v39 = vsel %vm717_vm1, %v2959_v36, 0.0 }
 0x6b2   : > { %1477 = vadd.xlane.f32.xlu1 %v1476_v39 }
 0x6b3   : > { %v1479_v40 = vsel %vm717_vm1, %v2962_v38, 0.0 }
 0x6b4   : > { %1480 = vadd.xlane.f32.xlu0 %v1479_v40 }
 0x6b5   : > { %p2167_p1 = scmp.ge.s32.totalorder %s3169_s0, 1 }
 0x73f   : > { %v1478_v41 = vpop.xlane.xlu1 %1477 }
 0x740   : > { %v1482_v42 = vmul.f32 0.015625, %v1478_v41 }
 0x741   : > { %v1481_v2 = vpop.xlane.xlu0 %1480 }
 0x742   : > { %v1484_v45 = vsub.f32 %v2959_v36, %v1482_v42  ;;  %v1483_v48 = vmul.f32 0.015625, %v1481_v2 }
 0x744   : > { %v1485_v3 = vsub.f32 %v2962_v38, %v1483_v48  ;;  %v1486_v49 = vmul.f32 %v1484_v45, %v1484_v45 }
 0x746   : > { %v1488_v50 = vsel %vm717_vm1, %v1486_v49, 0.0  ;;  %v1487_v51 = vmul.f32 %v1485_v3, %v1485_v3 }
 0x747   : > { %1489 = vadd.xlane.f32.xlu0 %v1488_v50 }
 0x748   : > { %v1491_v52 = vsel %vm717_vm1, %v1487_v51, 0.0 }
 0x74b   : > { %1492 = vadd.xlane.f32.xlu0 %v1491_v52 }
 0x7d4   : > { %v1490_v1 = vpop.xlane.xlu0 %1489 }
 0x7d5   : > { %v1494_v4 = vmul.f32 0.015625, %v1490_v1 }
 0x7d7   : > { %v1496_v5 = vadd.f32 1e-05, %v1494_v4  ;;  %v2150_v4 = vld [vmem:[%s702_s20] ss:$0 sm:$0xff] }
 0x7d8   : > { %v1493_v6 = vpop.xlane.xlu0 %1492 }
 0x7d9   : > { %2463 = vrsqrt.f32 %v1496_v5  ;;  %v1495_v7 = vmul.f32 0.015625, %v1493_v6 }
 0x7db   : > { %v1497_v8 = vadd.f32 1e-05, %v1495_v7 }
 0x7dd   : > { %2465 = vrsqrt.f32 %v1497_v8 }
 0x7e3   : > { %v2464_v46 = vpop.eup %2463 }
 0x7e4   : > { %v1500_v9 = vmul.f32 %v2464_v46, %v1484_v45 }
 0x7e6   : > { %v1508_v12 = vmul.f32 %v2139_v10, %v1500_v9 }
 0x7e7   : > { %v2466_v11 = vpop.eup %2465 }
 0x7e8   : > { %v1501_v13 = vmul.f32 %v2466_v11, %v1485_v3  ;;  %v1516_v16 = vadd.f32 %v2140_v14, %v1508_v12 }
 0x7ea   : > { %v1509_v15 = vmul.f32 %v2139_v10, %v1501_v13 }
 0x7ec   : > { %v1517_v17 = vadd.f32 %v2140_v14, %v1509_v15 }
 0x7ee   : > { %v1518_v18 = vpack.c.bf16 %v1517_v17, %v1516_v16 }
 0x7f0   : > { %2149 = vmatmul.mubr.msk.bf16.vlgmr.msra.gmra.mrb[24].mxu1 %vm717_vm1, %v1518_v18 }
 0x8c3   : > { %v1616_v35 = vpop.f32.mrb[24].mxu1 }
 0x8c4   : > { %v1617_v24 = vadd.f32 %v1616_v35, %v1532_v33  ;;  %v1618_v37 = vpop.f32.mrb[25].mxu1 }
 0x8c5   : > { %v1619_v39 = vadd.f32 %v1618_v37, %v1536_v34  ;;  %v1620_v40 = vpop.f32.mrb[26].mxu1 }
 0x8c6   : > { %v1630_v41 = vmul.f32 0.70710677, %v1617_v24  ;;  %v1621_v42 = vadd.f32 %v1620_v40, %v1532_v33  ;;  %v1622_v2 = vpop.f32.mrb[27].mxu1  ;;  %v1625_v53 = vmul.f32 0.5, %v1617_v24 }
 0x8c7   : > { %v1631_v45 = vmul.f32 0.70710677, %v1619_v39  ;;  %v1623_v48 = vadd.f32 %v1622_v2, %v1536_v34  ;;  %v1626_v56 = vmul.f32 0.5, %v1619_v39 }
 0x8c8   : > { %2467 = verf.f32 %v1630_v41  ;;  %v1632_v3 = vmul.f32 0.70710677, %v1621_v42  ;;  %v1627_v54 = vmul.f32 0.5, %v1621_v42 }
 0x8c9   : > { %2469 = verf.f32 %v1631_v45  ;;  %v1633_v49 = vmul.f32 0.70710677, %v1623_v48  ;;  %v1628_v57 = vmul.f32 0.5, %v1623_v48 }
 0x8ca   : > { %2471 = verf.f32 %v1632_v3 }
 0x8cb   : > { %2473 = verf.f32 %v1633_v49 }
 0x8d2   : > { %v2468_v44 = vpop.eup %2467 }
 0x8d3   : > { %v2470_v50 = vpop.eup %2469  ;;  %v1638_v43 = vadd.f32 1.0, %v2468_v44 }
 0x8d4   : > { %v2472_v47 = vpop.eup %2471  ;;  %v1639_v51 = vadd.f32 1.0, %v2470_v50 }
 0x8d5   : > { %v2474_v52 = vpop.eup %2473  ;;  %v1640_v55 = vadd.f32 1.0, %v2472_v47  ;;  %v1642_v59 = vmul.f32 %v1638_v43, %v1625_v53 }
 0x8d6   : > { %v1641_v58 = vadd.f32 1.0, %v2474_v52  ;;  %v1643_v61 = vmul.f32 %v1639_v51, %v1626_v56 }
 0x8d7   : > { %v1644_v60 = vmul.f32 %v1640_v55, %v1627_v54 }
 0x8d8   : > { %v1645_v62 = vmul.f32 %v1641_v58, %v1628_v57 }
 0x8d9   : > { %v1646_v63 = vpack.c.bf16 %v1644_v60, %v1642_v59 }
 0x8da   : > { %v1647_v0 = vpack.c.bf16 %v1645_v62, %v1643_v61 }
 0x8dc   : > { %1815 = vmatprep.mubr.bf16.mxu0 %v1647_v0 }
 0x8dd   : > { %1816 = vmatmul.mubr.bf16.vlgmr.msra.gmra.mrb[16].mxu0 %v1646_v63 }
 0x9b0   : > { %v2219_v1 = vpop.f32.mrb[16].mxu0 }
 0x9b1   : > { %v2220_v5 = vpop.f32.mrb[17].mxu0 }
 0x9b2   : > { %v2221_v6 = vadd.f32 %v2220_v5, %v2219_v1  ;;  %v2222_v7 = vpop.f32.mrb[18].mxu0  ;;  %1829 = sbr.rel (%p2167_p1) target bundleno = 2491 (0x9bb), region = 88 }
 0x9b3   : > { %v2223_v8 = vpop.f32.mrb[19].mxu0 }
 0x9b4   : > { %v1818_v46 = vadd.f32 %v2221_v6, %v2150_v4  ;;  %v2224_v9 = vadd.f32 %v2223_v8, %v2222_v7 }
 0x9b6   : > { %v1824_v10 = vadd.f32 %v1818_v46, %v2959_v36  ;;  %v1821_v11 = vadd.f32 %v2224_v9, %v2150_v4 }
 0x9b8   : > { %v1825_v12 = vadd.f32 %v1821_v11, %v2962_v38  ;;  %1830 = vst.msk [vmem:[%s2807_s3] sm:$0xff] (!%p2167_p1), %vm717_vm1, %v1824_v10 }
 0x9ba   : > { %1831 = vst.msk [vmem:[%s2807_s3 + $0x8] sm:$0xff] %vm717_vm1, %v1825_v12 }
 0x9bb PF: > { %s3170_s16 = sld [smem:[#allocation8_spill]] }
 0x9c1   : > { %p2168_p2 = scmp.ne.s32.totalorder %s3170_s16, 1 }
 0x9c2   : > { %v1838_v13 = vsel (!%p2168_p2), %vm717_vm1, %v1824_v10, 0.0  ;;  %v1841_v36 = vsel (!%p2168_p2), %vm717_vm1, %v1825_v12, 0.0  ;;  %s3171_s30 = sld [smem:[#allocation24_spill]] (!%p2168_p2)  ;;  %s3172_s22 = sld [smem:[#allocation25_spill]] (!%p2168_p2) }
 0x9c3   : > { %1835 = sbr.rel (%p2168_p2) target bundleno = 2816 (0xb00), region = 92  ;;  %1839 = vadd.xlane.f32.xlu0 (!%p2168_p2), %v1838_v13 }
 0x9c7   : > { %1842 = vadd.xlane.f32.xlu0 (!%p2168_p2), %v1841_v36 }
 0x9c8   : > { %v2169_v29 = vld [vmem:[%s3171_s30] ss:$0 sm:$0xff] (!%p2168_p2) }
 0x9c9   : > { %v2170_v33 = vld [vmem:[%s3172_s22] ss:$0 sm:$0xff] (!%p2168_p2) }
 0xa50   : > { %v1840_v38 = vpop.xlane.xlu0 %1839 }
 0xa51   : > { %v1844_v14 = vmul.f32 0.015625, %v1840_v38 }
 0xa53   : > { %v1846_v15 = vsub.f32 %v1824_v10, %v1844_v14 }
 0xa54   : > { %v1843_v16 = vpop.xlane.xlu0 %1842 }
 0xa55   : > { %v1845_v17 = vmul.f32 0.015625, %v1843_v16  ;;  %v1848_v18 = vmul.f32 %v1846_v15, %v1846_v15 }
 0xa57   : > { %v1847_v19 = vsub.f32 %v1825_v12, %v1845_v17  ;;  %v1850_v20 = vsel %vm717_vm1, %v1848_v18, 0.0 }
 0xa58   : > { %1851 = vadd.xlane.f32.xlu1 %v1850_v20 }
 0xa59   : > { %v1849_v21 = vmul.f32 %v1847_v19, %v1847_v19 }
 0xa5b   : > { %v1853_v22 = vsel %vm717_vm1, %v1849_v21, 0.0 }
 0xa5c   : > { %1854 = vadd.xlane.f32.xlu1 %v1853_v22 }
 0xae5   : > { %v1852_v23 = vpop.xlane.xlu1 %1851 }
 0xae6   : > { %v1856_v25 = vmul.f32 0.015625, %v1852_v23 }
 0xae8   : > { %v1858_v26 = vadd.f32 1e-05, %v1856_v25 }
 0xae9   : > { %v1855_v27 = vpop.xlane.xlu1 %1854 }
 0xaea   : > { %2475 = vrsqrt.f32 %v1858_v26  ;;  %v1857_v28 = vmul.f32 0.015625, %v1855_v27 }
 0xaec   : > { %v1859_v30 = vadd.f32 1e-05, %v1857_v28 }
 0xaee   : > { %2477 = vrsqrt.f32 %v1859_v30 }
 0xaf4   : > { %v2476_v32 = vpop.eup %2475 }
 0xaf5   : > { %v1862_v31 = vmul.f32 %v2476_v32, %v1846_v15 }
 0xaf7   : > { %v1870_v34 = vmul.f32 %v2169_v29, %v1862_v31 }
 0xaf8   : > { %v2478_v35 = vpop.eup %2477 }
 0xaf9   : > { %v1878_v24 = vadd.f32 %v2170_v33, %v1870_v34  ;;  %v1863_v37 = vmul.f32 %v2478_v35, %v1847_v19 }
 0xafb   : > { %1880 = vst.msk [vmem:[%s2807_s3] sm:$0xff] %vm717_vm1, %v1878_v24  ;;  %v1871_v39 = vmul.f32 %v2169_v29, %v1863_v37 }
 0xafd   : > { %v1879_v40 = vadd.f32 %v2170_v33, %v1871_v39 }
 0xaff   : > { %1881 = vst.msk [vmem:[%s2807_s3 + $0x8] sm:$0xff] %vm717_vm1, %v1879_v40 }
 0xb00 PF: > { %s3173_s21 = sld [smem:[#allocation9_spill]]  ;;  %s3174_s26 = sld [smem:[#allocation6_spill]] }
 0xb01   : > { %s3176_s14 = sld [smem:[#allocation26_spill]]  ;;  %s1896_s2 = sshll.u32 %s2807_s3, 4  ;;  %s3046_s2 = int_to_ptr.vmem [resolvable:$true] %s1896_s2 }
 0xb02   : > { %s2479_s13 = scalar_lea.vmem %s3046_s2, 256  ;;  %s2585_s23 = smov [#allocation2]  }
 0xb03   : > { %p2480_p4 = scmp.ne.s32.totalorder %s3046_s2, %s2479_s13  ;;  %s2483_s11 = sshll.u32 %s2585_s23, 4  ;;  %s2484_s11 = int_to_ptr.vmem [resolvable:$false] %s2483_s11 }
 0xb04   : > { %s2485_s28 = scalar_lea.vmem %s2484_s11, 512  ;;  %p2486_p7 = scmp.lt.s32.totalorder %s3046_s2, %s2484_s11 }
 0xb05   : > { %p2481_p5 = pnand %p2480_p4, %p2717_p3  ;;  %p2487_p8 = scmp.lt.s32.totalorder %s2485_s28, %s2479_s13 }
 0xb06   : > { %s2181_s15 = sshll.u32 %s3173_s21, 8  ;;  %s3177_s5 = sand.u32 1, %s3174_s26  }
 0xb07   : > { %s3043_s4 = scalar_lea.hbm %s3176_s14, %s2181_s15  ;;  %s3050_s19 = scalar_lea.sflag [#allocation3], %s3177_s5 }
 0xb08   : > { %p2482_p6 = pneg %p2481_p5  ;;  %p2488_p10 = por %p2487_p8, %p2486_p7 }
 0xb0a   : > { %p2489_p11 = pnand %p2488_p10, %p2482_p6 }
 0xb0c   : > { %2492 = shalt.err (!%p2489_p11)
}
 0xb0d   : > { %s2493_s3 = scalar_lea.hbm %s3043_s4, 256  ;;  %s2497_s20 = scalar_lea.hbm %s3176_s14, 512 }
 0xb0e   : > { %p2494_p12 = scmp.ne.s32.totalorder %s3043_s4, %s2493_s3  ;;  %p2498_p1 = scmp.lt.u32.totalorder %s3043_s4, %s3176_s14 }
 0xb0f   : > { %p2499_p2 = scmp.lt.u32.totalorder %s2497_s20, %s2493_s3  ;;  %p2501_p5 = scmp.lt.u32.totalorder %s2493_s3, %s3043_s4 }
 0xb10   : > { %p2495_p13 = pnand %p2494_p12, %p2717_p3 }
 0xb11   : > { %p2500_p4 = por %p2499_p2, %p2498_p1 }
 0xb12   : > { %p2496_p0 = pneg %p2495_p13 }
 0xb13   : > { %p2502_p6 = por %p2501_p5, %p2500_p4 }
 0xb15   : > { %p2503_p7 = pnand %p2502_p6, %p2496_p0 }
 0xb17   : > { %2506 = shalt.err (!%p2503_p7)
}
 0xb18   : > { %s2586_s18 = smov 128   ;;  %s2587_s29 = smov 8  }
 0xb19   : > { %2285 = dma.vmem_to_hbm [thread:$0]  (%p2717_p3), %s3046_s2, 256, %s3043_s4, %s3050_s19, %s2586_s18, %s2586_s18, %s2587_s29  }
 0xb1a PF: > { %s3178_s22 = sld [smem:[#allocation12_spill]]  ;;  %s3179_s21 = sld [smem:[#allocation5_spill]] }
 0xb20   : > { %p2291_p8 = scmp.ge.s32.totalorder %s3178_s22, 2  ;;  %s1911_s15 = sand.u32 1, %s3179_s21  }
 0xb21   : > { %s1912_s25 = scalar_lea.sflag [#allocation3], %s1911_s15 }
 0xb22   : > { %p2288_p10 = pnand %p2291_p8, %p2727_p9 }
 0xb24   : > { %2540 = dma.done.wait (!%p2288_p10), %s1912_s25, 256  }
 0xb25   : > { %2542 = vsyncadd (!%p2288_p10), %s1912_s25, 4294967040  ;;  %s28_s25 = sadd.s32 1, %s3178_s22   ;;  %s3181_s18 = sld [smem:[#allocation6_spill]] }
 0xb26   : > { %p25_p11 = scmp.ge.s32.totalorder %s28_s25, 6   ;;  %s3182_s19 = sld [smem:[#allocation7_spill]] }
 0xb27   : > { %s3183_s20 = sld [smem:[#allocation17_spill]]  ;;  %s3184_s21 = sld [smem:[#allocation10_spill]] }
 0xb28   : > { %s3185_s22 = sld [smem:[#allocation11_spill]]  ;;  %s3186_s23 = sld [smem:[#allocation13_spill]] }
 0xb29   : > { %s3187_s24 = sld [smem:[#allocation15_spill]]  ;;  %27 = sbr.rel (!%p25_p11) target bundleno = 15 (0xf), region = 163 }
 0xb30   :  { %1917 = vsyncpa [#allocation3], 1 }
 0xb31   :  { %1919 = vsyncpa [#allocation3 + $0x1], 1 }

</bundles_post_ra>
